<compile_context>
chip_gen: v6e
topology: v6e:2x2x1
jax: 0.10.0
libtpu: 0.0.40
codegen_flags: <defaults>
</compile_context>

<pallas_src>
import jax
import jax.numpy as jnp
from jax.experimental import pallas as pl
from jax.experimental.pallas import tpu as pltpu


# ---------------------------------------------------------------------------
# Fused kernel: shared-MLP chain (3->64->64->64->128->1024), running max over
# the point axis, and (at the last point chunk) bias+ReLU + fc(1024->emb)+ReLU.
# ---------------------------------------------------------------------------
def encoder_kernel(x_ref,
                   w1_ref, b1_ref, w2_ref, b2_ref, w3_ref, b3_ref,
                   w4_ref, b4_ref, w5_ref, b5_ref, wf_ref, bf_ref,
                   o_ref, acc_ref):
    n_idx = pl.program_id(1)
    n_last = pl.num_programs(1) - 1
    bt, nt, _ = x_ref.shape
    rows = bt * nt

    x = x_ref[...].reshape(rows, 3)              # (rows, 3) f32

    # Layer 1 (K=3): three VPU broadcast FMAs instead of a K=3 MXU matmul.
    h = (x[:, 0:1] * w1_ref[0:1, :]
         + x[:, 1:2] * w1_ref[1:2, :]
         + x[:, 2:3] * w1_ref[2:3, :]
         + b1_ref[...])
    h = jnp.maximum(h, 0.0)                      # (rows, 64) f32

    def layer(h, w_ref, b_ref):
        # bf16 MXU operands, f32 accumulation; bias add / ReLU stay in f32.
        y = jnp.dot(h.astype(jnp.bfloat16), w_ref[...],
                    preferred_element_type=jnp.float32) + b_ref[...]
        return jnp.maximum(y, 0.0)

    h = layer(h, w2_ref, b2_ref)                 # (rows, 64)
    h = layer(h, w3_ref, b3_ref)                 # (rows, 64)
    h = layer(h, w4_ref, b4_ref)                 # (rows, 128)

    # Layer 5: matmul only.  Bias + ReLU are hoisted to the epilogue since
    # relu(max_n(y) + b) == max_n(relu(y + b)) exactly.
    y5 = jnp.dot(h.astype(jnp.bfloat16), w5_ref[...],
                 preferred_element_type=jnp.float32)         # (rows, 1024)
    blk_max = jnp.max(y5.reshape(bt, nt, 1024), axis=1)      # (bt, 1024)

    @pl.when(n_idx == 0)
    def _():
        acc_ref[...] = blk_max

    @pl.when(n_idx > 0)
    def _():
        acc_ref[...] = jnp.maximum(acc_ref[...], blk_max)

    # Epilogue (last point chunk): layer-5 bias+ReLU on the pooled features,
    # then the fused fc = Linear(1024, emb) + BN + ReLU for this batch block.
    @pl.when(n_idx == n_last)
    def _():
        pooled = jnp.maximum(acc_ref[...] + b5_ref[...], 0.0)          # (bt, 1024)
        out = jnp.dot(pooled.astype(jnp.bfloat16), wf_ref[...],
                      preferred_element_type=jnp.float32) + bf_ref[...]
        o_ref[...] = jnp.maximum(out, 0.0).reshape(bt, 1, -1)


# ---------------------------------------------------------------------------
# Tiling / VMEM helpers.
# ---------------------------------------------------------------------------
def _chip_vmem_bytes():
    try:
        return int(pltpu.get_tpu_info().vmem_capacity_bytes)
    except Exception:
        return 64 * 1024 * 1024   # conservative (v7x-sized) fallback


def _pick_point_tile(n, cap):
    """Largest divisor of n that is a multiple of 8 and <= cap (else n)."""
    best = None
    d = 8
    while d <= min(n, cap):
        if n % d == 0:
            best = d
        d += 8
    return best if best is not None else n


def _pick_batch_tile(b, nt, target_rows):
    """Largest divisor of b with bt*nt <= target_rows, preferring >=2 batch
    blocks (so the 'parallel' axis can use both TensorCores on v7x)."""
    cands = [d for d in range(1, b + 1) if b % d == 0]

    def feasible(d, need_two):
        if d * nt > max(target_rows, nt):
            return False
        if need_two and b // d < 2:
            return False
        return True

    for need_two in (b >= 2, False):
        feas = [d for d in cands if feasible(d, need_two)]
        if feas:
            return max(feas)
    return 1


# ---------------------------------------------------------------------------
# Wrapper.
# ---------------------------------------------------------------------------
def encoder_forward(x_bnc, params):
    """x_bnc: (B, N, 3) float32.  Returns (B, emb_dim) float32."""
    B, N, cin = x_bnc.shape
    assert cin == 3
    emb_dim = params["wf"].shape[1]
    emb_pad = ((emb_dim + 127) // 128) * 128

    vmem_cap = _chip_vmem_bytes()
    rows_target = 4096 if vmem_cap >= 96 * 1024 * 1024 else 2048

    nt = _pick_point_tile(N, cap=rows_target)
    bt = _pick_batch_tile(B, nt, rows_target)
    n_chunks = N // nt
    b_blocks = B // bt

    # Weights: bf16 for the MXU layers, f32 for the tiny first layer + biases.
    mats = [params["w1"].astype(jnp.float32), params["b1"].astype(jnp.float32)]
    for nm in ("2", "3", "4", "5"):
        mats.append(params["w" + nm].astype(jnp.bfloat16))
        mats.append(params["b" + nm].astype(jnp.float32))

    # fc weights padded to a lane-dense multiple of 128 output columns.
    wf = jnp.zeros((1024, emb_pad), jnp.bfloat16).at[:, :emb_dim].set(
        params["wf"].astype(jnp.bfloat16))
    bf = jnp.zeros((1, emb_pad), jnp.float32).at[:, :emb_dim].set(
        params["bf"].astype(jnp.float32))
    mats += [wf, bf]

    def full_spec(arr):
        nd = arr.ndim
        return pl.BlockSpec(arr.shape, lambda b, n, _nd=nd: (0,) * _nd)

    in_specs = [pl.BlockSpec((bt, nt, 3), lambda b, n: (b, n, 0))]
    in_specs += [full_spec(m) for m in mats]

    # Corrected VMEM budget (lane/sublane padding, bf16 operand copies).
    rows = bt * nt
    bt_pad = max(bt, 8)
    weight_bytes = sum(int(m.size) * m.dtype.itemsize for m in mats)
    per_row_act = (128 * 4            # lane-padded (rows,3) f32 x view
                   + 2 * 64 * 4       # two live (rows,64) f32 stages
                   + 64 * 2 + 128 * 2 # bf16 MXU operand copies
                   + 128 * 4          # (rows,128) f32 h4
                   + 1024 * 4         # (rows,1024) f32 layer-5 output
                   + 1024 * 2)        # relayout / slack
    budget = (2 * rows * 128 * 4          # x block, double-buffered, lane-padded 3->128
              + 2 * bt_pad * emb_pad * 4  # output block, double-buffered, sublane-padded
              + bt_pad * 1024 * 4         # pooled-max accumulator scratch
              + 2 * weight_bytes          # weights (double-buffered by default)
              + rows * per_row_act)
    vmem_limit = int(min(max(budget * 1.25, 32 * 1024 * 1024),
                         0.85 * vmem_cap))

    out_pad = pl.pallas_call(
        encoder_kernel,
        out_shape=jax.ShapeDtypeStruct((B, 1, emb_pad), jnp.float32),
        grid=(b_blocks, n_chunks),
        in_specs=in_specs,
        out_specs=pl.BlockSpec((bt, 1, emb_pad), lambda b, n: (b, 0, 0)),
        scratch_shapes=[pltpu.VMEM((bt, 1024), jnp.float32)],
        compiler_params=pltpu.CompilerParams(
            dimension_semantics=("parallel", "arbitrary"),
            vmem_limit_bytes=vmem_limit),
    )(x_bnc, *mats)

    return out_pad[:, 0, :emb_dim]


# ---------------------------------------------------------------------------
# Parameter setup (eval-mode BatchNorm folded into the affine layers).
# ---------------------------------------------------------------------------
def _fold_bn(w, b, gamma, beta, mean, var, eps=1e-5):
    scale = gamma / jnp.sqrt(var + eps)          # (Cout,)
    w_eff = w * scale[None, :]                   # (Cin, Cout)
    b_eff = (b - mean) * scale + beta            # (Cout,)
    return w_eff.astype(jnp.float32), b_eff[None, :].astype(jnp.float32)


def init_params(key, emb_dim):
    dims = [(3, 64), (64, 64), (64, 64), (64, 128), (128, 1024), (1024, emb_dim)]
    names = ["1", "2", "3", "4", "5", "f"]
    params = {}
    for (cin, cout), nm in zip(dims, names):
        key, kw, kb = jax.random.split(key, 3)
        w = jax.random.normal(kw, (cin, cout), jnp.float32) * 0.05
        b = jax.random.normal(kb, (cout,), jnp.float32) * 0.01
        gamma = jnp.ones((cout,), jnp.float32)
        beta = jnp.zeros((cout,), jnp.float32)
        mean = jnp.zeros((cout,), jnp.float32)
        var = jnp.ones((cout,), jnp.float32)
        w_eff, b_eff = _fold_bn(w, b, gamma, beta, mean, var)
        params["w" + nm] = w_eff
        params["b" + nm] = b_eff
    return params


def reference_forward(x_bnc, params):
    """Pure-JAX f32 reference for a sanity check."""
    h = x_bnc
    for nm in ("1", "2", "3", "4", "5"):
        h = jnp.maximum(jnp.einsum("bnc,cd->bnd", h, params["w" + nm])
                        + params["b" + nm][None], 0.0)
    pooled = jnp.max(h, axis=1)                                    # (B, 1024)
    out = jnp.maximum(pooled @ params["wf"] + params["bf"], 0.0)   # (B, emb)
    return out


if __name__ == "__main__":
    B, N, EMB = 2, 16, 32
    key = jax.random.PRNGKey(0)
    key, kx = jax.random.split(key)

    # PyTorch-layout input (B, 3, N), transposed to the kernel's (B, N, 3).
    x_torch = jax.random.normal(kx, (B, 3, N), jnp.float32)
    x_bnc = jnp.transpose(x_torch, (0, 2, 1))

    params = init_params(key, EMB)

    out = encoder_forward(x_bnc, params)
    out = jax.block_until_ready(out)
    assert out.shape == (B, EMB), out.shape

    ref = reference_forward(x_bnc, params)
    err = float(jnp.max(jnp.abs(out - ref)))
    # bf16 MXU operands (f32 accumulation) vs. pure-f32 reference -> loosened tol.
    assert jnp.allclose(out, ref, atol=1e-2, rtol=5e-2), err

    print("KERNEL_OK")
</pallas_src>

<mosaic_0001>
module attributes {stable_mosaic.version = 11 : i64} {
  func.func @encoder_kernel(%arg0: i32, %arg1: i32, %arg2: memref<1x16x3xf32, #tpu.memory_space<vmem>>, %arg3: memref<3x64xf32, #tpu.memory_space<vmem>>, %arg4: memref<1x64xf32, #tpu.memory_space<vmem>>, %arg5: memref<64x64xbf16, #tpu.memory_space<vmem>>, %arg6: memref<1x64xf32, #tpu.memory_space<vmem>>, %arg7: memref<64x64xbf16, #tpu.memory_space<vmem>>, %arg8: memref<1x64xf32, #tpu.memory_space<vmem>>, %arg9: memref<64x128xbf16, #tpu.memory_space<vmem>>, %arg10: memref<1x128xf32, #tpu.memory_space<vmem>>, %arg11: memref<128x1024xbf16, #tpu.memory_space<vmem>>, %arg12: memref<1x1024xf32, #tpu.memory_space<vmem>>, %arg13: memref<1024x128xbf16, #tpu.memory_space<vmem>>, %arg14: memref<1x128xf32, #tpu.memory_space<vmem>>, %arg15: memref<1x1x128xf32, #tpu.memory_space<vmem>>, %arg16: memref<1x1024xf32, #tpu.memory_space<vmem>>) attributes {dimension_semantics = [#tpu.dimension_semantics<parallel>, #tpu.dimension_semantics<arbitrary>], iteration_bounds = array<i64: 2, 1>, scalar_prefetch = 0 : i64, scratch_operands = 1 : i64, tpu.core_type = #tpu.core_type<tc>, window_params = [{transform_indices = @transform_0, window_bounds = array<i64: 1, 16, 3>}, {pipeline_mode = #tpu.pipeline_mode<synchronous>, transform_indices = @transform_1, window_bounds = array<i64: 3, 64>}, {pipeline_mode = #tpu.pipeline_mode<synchronous>, transform_indices = @transform_2, window_bounds = array<i64: 1, 64>}, {pipeline_mode = #tpu.pipeline_mode<synchronous>, transform_indices = @transform_3, window_bounds = array<i64: 64, 64>}, {pipeline_mode = #tpu.pipeline_mode<synchronous>, transform_indices = @transform_4, window_bounds = array<i64: 1, 64>}, {pipeline_mode = #tpu.pipeline_mode<synchronous>, transform_indices = @transform_5, window_bounds = array<i64: 64, 64>}, {pipeline_mode = #tpu.pipeline_mode<synchronous>, transform_indices = @transform_6, window_bounds = array<i64: 1, 64>}, {pipeline_mode = #tpu.pipeline_mode<synchronous>, transform_indices = @transform_7, window_bounds = array<i64: 64, 128>}, {pipeline_mode = #tpu.pipeline_mode<synchronous>, transform_indices = @transform_8, window_bounds = array<i64: 1, 128>}, {pipeline_mode = #tpu.pipeline_mode<synchronous>, transform_indices = @transform_9, window_bounds = array<i64: 128, 1024>}, {pipeline_mode = #tpu.pipeline_mode<synchronous>, transform_indices = @transform_10, window_bounds = array<i64: 1, 1024>}, {pipeline_mode = #tpu.pipeline_mode<synchronous>, transform_indices = @transform_11, window_bounds = array<i64: 1024, 128>}, {pipeline_mode = #tpu.pipeline_mode<synchronous>, transform_indices = @transform_12, window_bounds = array<i64: 1, 128>}, {transform_indices = @transform_13, window_bounds = array<i64: 1, 1, 128>}]} {
    %c0 = arith.constant 0 : index
    %c0_0 = arith.constant 0 : index
    %c0_1 = arith.constant 0 : index
    %0 = vector.load %arg2[%c0, %c0_0, %c0_1] : memref<1x16x3xf32, #tpu.memory_space<vmem>>, vector<1x16x3xf32>
    %1 = vector.shape_cast %0 : vector<1x16x3xf32> to vector<16x3xf32>
    %2 = vector.extract_strided_slice %1 {offsets = [0, 0], sizes = [16, 1], strides = [1, 1]} : vector<16x3xf32> to vector<16x1xf32>
    %c0_2 = arith.constant 0 : index
    %c0_3 = arith.constant 0 : index
    %3 = vector.load %arg3[%c0_2, %c0_3] : memref<3x64xf32, #tpu.memory_space<vmem>>, vector<1x64xf32>
    %4 = vector.broadcast %2 : vector<16x1xf32> to vector<16x64xf32>
    %5 = vector.broadcast %3 : vector<1x64xf32> to vector<16x64xf32>
    %6 = arith.mulf %4, %5 : vector<16x64xf32>
    %7 = vector.extract_strided_slice %1 {offsets = [0, 1], sizes = [16, 1], strides = [1, 1]} : vector<16x3xf32> to vector<16x1xf32>
    %c1 = arith.constant 1 : index
    %c0_4 = arith.constant 0 : index
    %8 = vector.load %arg3[%c1, %c0_4] : memref<3x64xf32, #tpu.memory_space<vmem>>, vector<1x64xf32>
    %9 = vector.broadcast %7 : vector<16x1xf32> to vector<16x64xf32>
    %10 = vector.broadcast %8 : vector<1x64xf32> to vector<16x64xf32>
    %11 = arith.mulf %9, %10 : vector<16x64xf32>
    %12 = arith.addf %6, %11 : vector<16x64xf32>
    %13 = vector.extract_strided_slice %1 {offsets = [0, 2], sizes = [16, 1], strides = [1, 1]} : vector<16x3xf32> to vector<16x1xf32>
    %c2 = arith.constant 2 : index
    %c0_5 = arith.constant 0 : index
    %14 = vector.load %arg3[%c2, %c0_5] : memref<3x64xf32, #tpu.memory_space<vmem>>, vector<1x64xf32>
    %15 = vector.broadcast %13 : vector<16x1xf32> to vector<16x64xf32>
    %16 = vector.broadcast %14 : vector<1x64xf32> to vector<16x64xf32>
    %17 = arith.mulf %15, %16 : vector<16x64xf32>
    %18 = arith.addf %12, %17 : vector<16x64xf32>
    %c0_6 = arith.constant 0 : index
    %c0_7 = arith.constant 0 : index
    %19 = vector.load %arg4[%c0_6, %c0_7] : memref<1x64xf32, #tpu.memory_space<vmem>>, vector<1x64xf32>
    %20 = vector.broadcast %19 : vector<1x64xf32> to vector<16x64xf32>
    %21 = arith.addf %18, %20 : vector<16x64xf32>
    %cst = arith.constant 0.000000e+00 : f32
    %22 = vector.broadcast %cst : f32 to vector<16x64xf32>
    %23 = arith.maximumf %21, %22 : vector<16x64xf32>
    %24 = arith.truncf %23 : vector<16x64xf32> to vector<16x64xbf16>
    %c0_8 = arith.constant 0 : index
    %c0_9 = arith.constant 0 : index
    %25 = vector.load %arg5[%c0_8, %c0_9] : memref<64x64xbf16, #tpu.memory_space<vmem>>, vector<64x64xbf16>
    %cst_10 = arith.constant dense<0.000000e+00> : vector<16x64xf32>
    %26 = tpu.matmul %24, %25, %cst_10 {dimension_numbers = #tpu.dot_dimension_numbers<[1], [0], [0], [1], [0, 0, 1, 1], [], []>} : vector<16x64xbf16>, vector<64x64xbf16>, vector<16x64xf32> -> vector<16x64xf32>
    %c0_11 = arith.constant 0 : index
    %c0_12 = arith.constant 0 : index
    %27 = vector.load %arg6[%c0_11, %c0_12] : memref<1x64xf32, #tpu.memory_space<vmem>>, vector<1x64xf32>
    %28 = vector.broadcast %27 : vector<1x64xf32> to vector<16x64xf32>
    %29 = arith.addf %26, %28 : vector<16x64xf32>
    %cst_13 = arith.constant 0.000000e+00 : f32
    %30 = vector.broadcast %cst_13 : f32 to vector<16x64xf32>
    %31 = arith.maximumf %29, %30 : vector<16x64xf32>
    %32 = arith.truncf %31 : vector<16x64xf32> to vector<16x64xbf16>
    %c0_14 = arith.constant 0 : index
    %c0_15 = arith.constant 0 : index
    %33 = vector.load %arg7[%c0_14, %c0_15] : memref<64x64xbf16, #tpu.memory_space<vmem>>, vector<64x64xbf16>
    %cst_16 = arith.constant dense<0.000000e+00> : vector<16x64xf32>
    %34 = tpu.matmul %32, %33, %cst_16 {dimension_numbers = #tpu.dot_dimension_numbers<[1], [0], [0], [1], [0, 0, 1, 1], [], []>} : vector<16x64xbf16>, vector<64x64xbf16>, vector<16x64xf32> -> vector<16x64xf32>
    %c0_17 = arith.constant 0 : index
    %c0_18 = arith.constant 0 : index
    %35 = vector.load %arg8[%c0_17, %c0_18] : memref<1x64xf32, #tpu.memory_space<vmem>>, vector<1x64xf32>
    %36 = vector.broadcast %35 : vector<1x64xf32> to vector<16x64xf32>
    %37 = arith.addf %34, %36 : vector<16x64xf32>
    %cst_19 = arith.constant 0.000000e+00 : f32
    %38 = vector.broadcast %cst_19 : f32 to vector<16x64xf32>
    %39 = arith.maximumf %37, %38 : vector<16x64xf32>
    %40 = arith.truncf %39 : vector<16x64xf32> to vector<16x64xbf16>
    %c0_20 = arith.constant 0 : index
    %c0_21 = arith.constant 0 : index
    %41 = vector.load %arg9[%c0_20, %c0_21] : memref<64x128xbf16, #tpu.memory_space<vmem>>, vector<64x128xbf16>
    %cst_22 = arith.constant dense<0.000000e+00> : vector<16x128xf32>
    %42 = tpu.matmul %40, %41, %cst_22 {dimension_numbers = #tpu.dot_dimension_numbers<[1], [0], [0], [1], [0, 0, 1, 1], [], []>} : vector<16x64xbf16>, vector<64x128xbf16>, vector<16x128xf32> -> vector<16x128xf32>
    %c0_23 = arith.constant 0 : index
    %c0_24 = arith.constant 0 : index
    %43 = vector.load %arg10[%c0_23, %c0_24] : memref<1x128xf32, #tpu.memory_space<vmem>>, vector<1x128xf32>
    %44 = vector.broadcast %43 : vector<1x128xf32> to vector<16x128xf32>
    %45 = arith.addf %42, %44 : vector<16x128xf32>
    %cst_25 = arith.constant 0.000000e+00 : f32
    %46 = vector.broadcast %cst_25 : f32 to vector<16x128xf32>
    %47 = arith.maximumf %45, %46 : vector<16x128xf32>
    %48 = arith.truncf %47 : vector<16x128xf32> to vector<16x128xbf16>
    %c0_26 = arith.constant 0 : index
    %c0_27 = arith.constant 0 : index
    %49 = vector.load %arg11[%c0_26, %c0_27] : memref<128x1024xbf16, #tpu.memory_space<vmem>>, vector<128x1024xbf16>
    %cst_28 = arith.constant dense<0.000000e+00> : vector<16x1024xf32>
    %50 = tpu.matmul %48, %49, %cst_28 {dimension_numbers = #tpu.dot_dimension_numbers<[1], [0], [0], [1], [0, 0, 1, 1], [], []>} : vector<16x128xbf16>, vector<128x1024xbf16>, vector<16x1024xf32> -> vector<16x1024xf32>
    %51 = vector.shape_cast %50 : vector<16x1024xf32> to vector<1x16x1024xf32>
    %cst_29 = arith.constant dense<0xFF800000> : vector<1x1024xf32>
    %52 = vector.multi_reduction <maximumf>, %51, %cst_29 [1] : vector<1x16x1024xf32> to vector<1x1024xf32>
    %c0_i32 = arith.constant 0 : i32
    %53 = arith.cmpi eq, %arg1, %c0_i32 : i32
    %54 = arith.extui %53 : i1 to i32
    %c0_i32_30 = arith.constant 0 : i32
    %55 = arith.cmpi ne, %54, %c0_i32_30 : i32
    scf.if %55 {
      %c0_35 = arith.constant 0 : index
      %c0_36 = arith.constant 0 : index
      %62 = vector.load %arg16[%c0_35, %c0_36] : memref<1x1024xf32, #tpu.memory_space<vmem>>, vector<1x1024xf32>
      tpu.vector_store %arg16[%c0_35, %c0_36], %52 {strides = array<i32>} : memref<1x1024xf32, #tpu.memory_space<vmem>>, vector<1x1024xf32>,
    } else {
    }
    %c0_i32_31 = arith.constant 0 : i32
    %56 = arith.cmpi sgt, %arg1, %c0_i32_31 : i32
    %57 = arith.extui %56 : i1 to i32
    %c0_i32_32 = arith.constant 0 : i32
    %58 = arith.cmpi ne, %57, %c0_i32_32 : i32
    scf.if %58 {
      %c0_35 = arith.constant 0 : index
      %c0_36 = arith.constant 0 : index
      %62 = vector.load %arg16[%c0_35, %c0_36] : memref<1x1024xf32, #tpu.memory_space<vmem>>, vector<1x1024xf32>
      %63 = arith.maximumf %62, %52 : vector<1x1024xf32>
      %c0_37 = arith.constant 0 : index
      %c0_38 = arith.constant 0 : index
      %64 = vector.load %arg16[%c0_37, %c0_38] : memref<1x1024xf32, #tpu.memory_space<vmem>>, vector<1x1024xf32>
      tpu.vector_store %arg16[%c0_37, %c0_38], %63 {strides = array<i32>} : memref<1x1024xf32, #tpu.memory_space<vmem>>, vector<1x1024xf32>,
    } else {
    }
    %c0_i32_33 = arith.constant 0 : i32
    %59 = arith.cmpi eq, %arg1, %c0_i32_33 : i32
    %60 = arith.extui %59 : i1 to i32
    %c0_i32_34 = arith.constant 0 : i32
    %61 = arith.cmpi ne, %60, %c0_i32_34 : i32
    scf.if %61 {
      %c0_35 = arith.constant 0 : index
      %c0_36 = arith.constant 0 : index
      %62 = vector.load %arg16[%c0_35, %c0_36] : memref<1x1024xf32, #tpu.memory_space<vmem>>, vector<1x1024xf32>
      %c0_37 = arith.constant 0 : index
      %c0_38 = arith.constant 0 : index
      %63 = vector.load %arg12[%c0_37, %c0_38] : memref<1x1024xf32, #tpu.memory_space<vmem>>, vector<1x1024xf32>
      %64 = arith.addf %62, %63 : vector<1x1024xf32>
      %cst_39 = arith.constant 0.000000e+00 : f32
      %65 = vector.broadcast %cst_39 : f32 to vector<1x1024xf32>
      %66 = arith.maximumf %64, %65 : vector<1x1024xf32>
      %67 = arith.truncf %66 : vector<1x1024xf32> to vector<1x1024xbf16>
      %c0_40 = arith.constant 0 : index
      %c0_41 = arith.constant 0 : index
      %68 = vector.load %arg13[%c0_40, %c0_41] : memref<1024x128xbf16, #tpu.memory_space<vmem>>, vector<1024x128xbf16>
      %cst_42 = arith.constant dense<0.000000e+00> : vector<1x128xf32>
      %69 = tpu.matmul %67, %68, %cst_42 {dimension_numbers = #tpu.dot_dimension_numbers<[1], [0], [0], [1], [0, 0, 1, 1], [], []>} : vector<1x1024xbf16>, vector<1024x128xbf16>, vector<1x128xf32> -> vector<1x128xf32>
      %c0_43 = arith.constant 0 : index
      %c0_44 = arith.constant 0 : index
      %70 = vector.load %arg14[%c0_43, %c0_44] : memref<1x128xf32, #tpu.memory_space<vmem>>, vector<1x128xf32>
      %71 = arith.addf %69, %70 : vector<1x128xf32>
      %cst_45 = arith.constant 0.000000e+00 : f32
      %72 = vector.broadcast %cst_45 : f32 to vector<1x128xf32>
      %73 = arith.maximumf %71, %72 : vector<1x128xf32>
      %74 = vector.shape_cast %73 : vector<1x128xf32> to vector<1x1x128xf32>
      %c0_46 = arith.constant 0 : index
      %c0_47 = arith.constant 0 : index
      %c0_48 = arith.constant 0 : index
      %75 = vector.load %arg15[%c0_46, %c0_47, %c0_48] : memref<1x1x128xf32, #tpu.memory_space<vmem>>, vector<1x1x128xf32>
      tpu.vector_store %arg15[%c0_46, %c0_47, %c0_48], %74 {strides = array<i32>} : memref<1x1x128xf32, #tpu.memory_space<vmem>>, vector<1x1x128xf32>,
    } else {
    }
    return
  }
  func.func @transform_0(%arg0: i32, %arg1: i32) -> (i32, i32, i32) {
    %c0_i32 = arith.constant 0 : i32
    %c0_i32_0 = arith.constant 0 : i32
    return %arg0, %arg1, %c0_i32 : i32, i32, i32
  }
  func.func @transform_1(%arg0: i32, %arg1: i32) -> (i32, i32) {
    %c0_i32 = arith.constant 0 : i32
    %c0_i32_0 = arith.constant 0 : i32
    %c0_i32_1 = arith.constant 0 : i32
    return %c0_i32, %c0_i32_0 : i32, i32
  }
  func.func @transform_2(%arg0: i32, %arg1: i32) -> (i32, i32) {
    %c0_i32 = arith.constant 0 : i32
    %c0_i32_0 = arith.constant 0 : i32
    %c0_i32_1 = arith.constant 0 : i32
    return %c0_i32, %c0_i32_0 : i32, i32
  }
  func.func @transform_3(%arg0: i32, %arg1: i32) -> (i32, i32) {
    %c0_i32 = arith.constant 0 : i32
    %c0_i32_0 = arith.constant 0 : i32
    %c0_i32_1 = arith.constant 0 : i32
    return %c0_i32, %c0_i32_0 : i32, i32
  }
  func.func @transform_4(%arg0: i32, %arg1: i32) -> (i32, i32) {
    %c0_i32 = arith.constant 0 : i32
    %c0_i32_0 = arith.constant 0 : i32
    %c0_i32_1 = arith.constant 0 : i32
    return %c0_i32, %c0_i32_0 : i32, i32
  }
  func.func @transform_5(%arg0: i32, %arg1: i32) -> (i32, i32) {
    %c0_i32 = arith.constant 0 : i32
    %c0_i32_0 = arith.constant 0 : i32
    %c0_i32_1 = arith.constant 0 : i32
    return %c0_i32, %c0_i32_0 : i32, i32
  }
  func.func @transform_6(%arg0: i32, %arg1: i32) -> (i32, i32) {
    %c0_i32 = arith.constant 0 : i32
    %c0_i32_0 = arith.constant 0 : i32
    %c0_i32_1 = arith.constant 0 : i32
    return %c0_i32, %c0_i32_0 : i32, i32
  }
  func.func @transform_7(%arg0: i32, %arg1: i32) -> (i32, i32) {
    %c0_i32 = arith.constant 0 : i32
    %c0_i32_0 = arith.constant 0 : i32
    %c0_i32_1 = arith.constant 0 : i32
    return %c0_i32, %c0_i32_0 : i32, i32
  }
  func.func @transform_8(%arg0: i32, %arg1: i32) -> (i32, i32) {
    %c0_i32 = arith.constant 0 : i32
    %c0_i32_0 = arith.constant 0 : i32
    %c0_i32_1 = arith.constant 0 : i32
    return %c0_i32, %c0_i32_0 : i32, i32
  }
  func.func @transform_9(%arg0: i32, %arg1: i32) -> (i32, i32) {
    %c0_i32 = arith.constant 0 : i32
    %c0_i32_0 = arith.constant 0 : i32
    %c0_i32_1 = arith.constant 0 : i32
    return %c0_i32, %c0_i32_0 : i32, i32
  }
  func.func @transform_10(%arg0: i32, %arg1: i32) -> (i32, i32) {
    %c0_i32 = arith.constant 0 : i32
    %c0_i32_0 = arith.constant 0 : i32
    %c0_i32_1 = arith.constant 0 : i32
    return %c0_i32, %c0_i32_0 : i32, i32
  }
  func.func @transform_11(%arg0: i32, %arg1: i32) -> (i32, i32) {
    %c0_i32 = arith.constant 0 : i32
    %c0_i32_0 = arith.constant 0 : i32
    %c0_i32_1 = arith.constant 0 : i32
    return %c0_i32, %c0_i32_0 : i32, i32
  }
  func.func @transform_12(%arg0: i32, %arg1: i32) -> (i32, i32) {
    %c0_i32 = arith.constant 0 : i32
    %c0_i32_0 = arith.constant 0 : i32
    %c0_i32_1 = arith.constant 0 : i32
    return %c0_i32, %c0_i32_0 : i32, i32
  }
  func.func @transform_13(%arg0: i32, %arg1: i32) -> (i32, i32, i32) {
    %c0_i32 = arith.constant 0 : i32
    %c0_i32_0 = arith.constant 0 : i32
    %c0_i32_1 = arith.constant 0 : i32
    return %arg0, %c0_i32, %c0_i32_0 : i32, i32, i32
  }
}

</mosaic_0001>

<bundles_post_ra>
// kernel: tpu_custom_call.1
= control target key start
LH: loop header
LB: loop body
LE: loop exit
PB: predicated region body
PF: predicated region fallthrough
CT: control target
= control target key end

     0   :  { %s3539_s0 = inlined_call_operand.vmem [shape: f32[2,16,3], index: 0, kind: input, shape index: {}]   ;;  %s3540_s1 = inlined_call_operand.hbm [shape: f32[3,64], index: 1, kind: input, shape index: {}]   ;;  %s3541_s2 = inlined_call_operand.vmem [shape: f32[1,64], index: 2, kind: input, shape index: {}]   ;;  %s3542_s3 = inlined_call_operand.vmem [shape: bf16[64,64], index: 3, kind: input, shape index: {}]   ;;  %s3543_s4 = inlined_call_operand.vmem [shape: f32[1,64], index: 4, kind: input, shape index: {}]   ;;  %s3544_s5 = inlined_call_operand.hbm [shape: bf16[64,64], index: 5, kind: input, shape index: {}]   ;;  %s3545_s6 = inlined_call_operand.vmem [shape: f32[1,64], index: 6, kind: input, shape index: {}]   ;;  %s3546_s7 = inlined_call_operand.hbm [shape: bf16[64,128], index: 7, kind: input, shape index: {}]   ;;  %s3547_s8 = inlined_call_operand.vmem [shape: f32[1,128], index: 8, kind: input, shape index: {}]   ;;  %s3548_s9 = inlined_call_operand.hbm [shape: bf16[128,1024], index: 9, kind: input, shape index: {}]   ;;  %s3549_s10 = inlined_call_operand.vmem [shape: f32[1,1024], index: 10, kind: input, shape index: {}]   ;;  %s3550_s11 = inlined_call_operand.hbm [shape: bf16[1024,128], index: 11, kind: input, shape index: {}]   ;;  %s3551_s12 = inlined_call_operand.vmem [shape: f32[1,128], index: 12, kind: input, shape index: {}]   ;;  %s3552_s13 = inlined_call_operand.hbm [shape: f32[2,1,128], index: 13, kind: output, shape index: {}]  }
   0x1   :  { %3569 = sst [smem:[#allocation24_spill]] %s3552_s13 }
   0x2   :  { %18 = vsyncpa [#allocation4], 0 }
   0x3   :  { %19 = vsyncpa [#allocation7], 0 }
   0x4   :  { %20 = vsyncpa [#allocation10], 0 }
   0x5   :  { %21 = vsyncpa [#allocation5], 0 }
   0x6   :  { %23 = vsyncpa [#allocation5 + $0x1], 0  ;;  %s3277_s25 = smov 0   ;;  %s3279_s26 = smov 0  }
   0x7   :  { %s3281_s27 = smov 0   ;;  %s3283_s28 = smov 0  }
   0x8   :  { %s3285_s29 = smov 0   ;;  %s3287_s30 = smov 0  }
   0x9 LB: > { %3570 = sst [smem:[#allocation17_spill]] %s3169_s25  ;;  %s2465_s14 = sadd.s32 4294967295, %s3189_s30   ;;  %s3189_s30 = sphi %s3287_s30, %s29_s30   ;;  %s3185_s29 = sphi %s3285_s29, %s3596_s29   ;;  %s3181_s28 = sphi %s3283_s28, %s3599_s28   ;;  %s3177_s27 = sphi %s3281_s27, %s3594_s27   ;;  %s3173_s26 = sphi %s3279_s26, %s3598_s26   ;;  %s3169_s25 = sphi %s3277_s25, %s3597_s25  }
   0xa   : > { %3571 = sst [smem:[#allocation18_spill]] %s3177_s27  ;;  %s2466_s15 = sadd.s32 4294967294, %s3189_s30  }
   0xb   : > { %3572 = sst [smem:[#allocation19_spill]] %s3185_s29  ;;  %s41_s16 = sadd.s32 1, %s3185_s29 }
   0xc   : > { %3573 = sst [smem:[#allocation20_spill]] %s3189_s30  ;;  %s328_s17 = sadd.s32 1, %s3177_s27 }
   0xd   : > { %p43_p0 = scmp.ge.s32.totalorder %s41_s16, 2  ;;  %p338_p1 = scmp.ne.s32.totalorder %s3177_s27, %s3173_s26 }
   0xe   : > { %p339_p2 = scmp.eq.s32.totalorder %s2465_s14, 1  ;;  %p344_p3 = scmp.ne.s32.totalorder %s3173_s26, %s3169_s25 }
   0xf   : > { %s3601_s16 = smov (%p43_p0, %s41_s16), 0  ;;  %p345_p5 = scmp.eq.s32.totalorder %s2466_s15, 1 }
  0x10   : > { %3574 = sst [smem:[#allocation21_spill]] %s3601_s16  ;;  %p3317_p4 = por %p339_p2, %p338_p1 }
  0x11   : > { %s325_s19 = ssub.s32 %s3185_s29, %s3601_s16  ;;  %p2467_p6 = scmp.ge.s32.totalorder %s3189_s30, 1 }
  0x12   : > { %s3575_s18 = scalar_select %p3317_p4, 1, 0 }
  0x13   : > { %p326_p7 = scmp.eq.s32.totalorder %s325_s19, 0  ;;  %p3324_p8 = por %p345_p5, %p344_p3 }
  0x14   : > { %p352_p9 = scmp.lt.s32.totalorder %s3189_s30, 3  ;;  %p3336_p11 = scmp.eq.s32.totalorder %s2465_s14, 0 }
  0x15   : > { %s3576_s20 = scalar_select %p3324_p8, 1, 0 }
  0x16   : > { %s3330_s21 = scalar_select %p326_p7, %s3177_s27, %s328_s17  }
  0x17   : > { %3577 = sst [smem:[#allocation22_spill]] %s3576_s20  ;;  %p3332_p10 = pnand %p2467_p6, %p352_p9 }
  0x18   : > { %3578 = sst [smem:[#allocation23_spill]] %s3330_s21  ;;  %s3191_s24 = smov [#allocation6]  }
  0x19   : > { %s3579_s22 = scalar_select %p3332_p10, 1, 0 }
  0x1a   : > { %s3580_s23 = scalar_select %p3336_p11, 1, 0 }
  0x1b   : > { %p2797_p12 = pneg %p3332_p10  ;;  %s384_s15 = sshll.u32 %s3191_s24, 4  ;;  %s385_s15 = int_to_ptr.vmem [resolvable:$true] %s384_s15 }
  0x1c   : > { %s3192_s17 = smov [#allocation9]   ;;  %s2982_s29 = scalar_lea.vmem %s385_s15, 512 }
  0x1d   : > { %p3344_p13 = pnand %p3336_p11, %p2797_p12  ;;  %s416_s16 = sshll.u32 %s3192_s17, 4  ;;  %s417_s16 = int_to_ptr.vmem [resolvable:$true] %s416_s16 }
  0x1e   : > { %p2983_p1 = scmp.ne.s32.totalorder %s385_s15, %s2982_s29  ;;  %p2990_p5 = scmp.lt.s32.totalorder %s385_s15, %s385_s15 }
  0x1f   : > { %p3350_p0 = pneg %p3344_p13  ;;  %p2991_p6 = scmp.lt.s32.totalorder %s2982_s29, %s2982_s29 }
  0x21   : > { %p2985_p2 = pnand %p2983_p1, %p3350_p0  ;;  %p2992_p7 = por %p2991_p6, %p2990_p5 }
  0x23   : > { %p2986_p3 = pneg %p2985_p2 }
  0x25   : > { %p2993_p9 = pnand %p2992_p7, %p2986_p3 }
  0x27   : > { %2996 = shalt.err (!%p2993_p9)
}
  0x28   : > { %s3561_s24 = smov 64   ;;  %s3563_s17 = smov 4  }
  0x29   : > { %2803 = dma.hbm_to_vmem [thread:$0]  (!%p3344_p13), %s3544_s5, 512, %s385_s15, [#allocation7], %s3561_s24, %s3561_s24, %s3563_s17  }
  0x2a   : > { %s3008_s20 = scalar_lea.vmem %s417_s16, 8192  ;;  %p3016_p5 = scmp.lt.s32.totalorder %s417_s16, %s417_s16 }
  0x2b   : > { %p3009_p12 = scmp.ne.s32.totalorder %s417_s16, %s3008_s20  ;;  %p3017_p3 = scmp.lt.s32.totalorder %s3008_s20, %s3008_s20 }
  0x2d   : > { %p3011_p1 = pnand %p3009_p12, %p3350_p0  ;;  %p3018_p6 = por %p3017_p3, %p3016_p5 }
  0x2f   : > { %p3012_p2 = pneg %p3011_p1 }
  0x31   : > { %p3019_p7 = pnand %p3018_p6, %p3012_p2 }
  0x33   : > { %3022 = shalt.err (!%p3019_p7)
}
  0x34   : > { %s3195_s29 = smov 512   ;;  %s3196_s25 = smov 32  }
  0x35   : > { %2809 = dma.hbm_to_vmem [thread:$0]  (!%p3344_p13), %s3548_s9, 8192, %s417_s16, [#allocation10], %s3195_s29, %s3195_s29, %s3196_s25  }
  0x36   : > { %s3197_s27 = smov [#allocation3]   ;;  %s3198_s15 = smov [#allocation8]  }
  0x37   : > { %s365_s21 = sshll.u32 %s3197_s27, 4  ;;  %s400_s24 = sshll.u32 %s3198_s15, 4  ;;  %s366_s21 = int_to_ptr.vmem [resolvable:$true] %s365_s21  ;;  %s401_s24 = int_to_ptr.vmem [resolvable:$true] %s400_s24 }
  0x38   : > { %s3034_s17 = scalar_lea.vmem %s366_s21, 64  ;;  %p3042_p2 = scmp.lt.s32.totalorder %s366_s21, %s366_s21 }
  0x39   : > { %p3035_p9 = scmp.ne.s32.totalorder %s366_s21, %s3034_s17  ;;  %p3043_p5 = scmp.lt.s32.totalorder %s3034_s17, %s3034_s17 }
  0x3b   : > { %p3037_p12 = pnand %p3035_p9, %p3350_p0  ;;  %p3044_p3 = por %p3043_p5, %p3042_p2 }
  0x3d   : > { %p3038_p1 = pneg %p3037_p12 }
  0x3f   : > { %p3045_p6 = pnand %p3044_p3, %p3038_p1 }
  0x41   : > { %3048 = shalt.err (!%p3045_p6)
}
  0x42   : > { %2800 = dma.hbm_to_vmem [thread:$0]  (!%p3344_p13), %s3540_s1, 64, %s366_s21, [#allocation4]  }
  0x43   : > { %s3060_s25 = scalar_lea.vmem %s401_s24, 512  ;;  %p3068_p9 = scmp.lt.s32.totalorder %s401_s24, %s401_s24 }
  0x44   : > { %p3061_p7 = scmp.ne.s32.totalorder %s401_s24, %s3060_s25  ;;  %p3069_p12 = scmp.lt.s32.totalorder %s3060_s25, %s3060_s25 }
  0x46   : > { %p3063_p8 = pnand %p3061_p7, %p3350_p0  ;;  %p3070_p11 = por %p3069_p12, %p3068_p9 }
  0x48   : > { %p3064_p4 = pneg %p3063_p8 }
  0x4a   : > { %p3071_p10 = pnand %p3070_p11, %p3064_p4 }
  0x4c   : > { %3074 = shalt.err (!%p3071_p10)
}
  0x4d   : > { %s3583_s30 = smov 4   ;;  %s3584_s16 = smov 64  }
  0x4e   : > { %2806 = dma.hbm_to_vmem [thread:$0]  (!%p3344_p13), %s3546_s7, 512, %s401_s24, [#allocation7], %s3584_s16, %s3584_s16, %s3583_s30  }
  0x4f   : > { %s3199_s27 = smov [#allocation11]  }
  0x50   : > { %s432_s21 = sshll.u32 %s3199_s27, 4  ;;  %s433_s21 = int_to_ptr.vmem [resolvable:$true] %s432_s21 }
  0x51   : > { %s3086_s15 = scalar_lea.vmem %s433_s21, 8192  ;;  %p3094_p4 = scmp.lt.s32.totalorder %s433_s21, %s433_s21 }
  0x52   : > { %p3087_p8 = scmp.ne.s32.totalorder %s433_s21, %s3086_s15  ;;  %p3095_p10 = scmp.lt.s32.totalorder %s3086_s15, %s3086_s15 }
  0x54   : > { %p3089_p1 = pnand %p3087_p8, %p3350_p0  ;;  %p3096_p11 = por %p3095_p10, %p3094_p4 }
  0x56   : > { %p3090_p2 = pneg %p3089_p1 }
  0x58   : > { %p3097_p5 = pnand %p3096_p11, %p3090_p2 }
  0x5a   : > { %3100 = shalt.err (!%p3097_p5)
}
  0x5b   : > { %2812 = dma.hbm_to_vmem [thread:$0]  (!%p3344_p13), %s3550_s11, 8192, %s433_s21, [#allocation10], %s3584_s16, %s3584_s16, %s3583_s30  }
  0x5c   : > { %p3585_p3 = scmp.ne.s32.totalorder %s3579_s22, 0 }
  0x5d   : > { %p3586_p0 = scmp.ne.s32.totalorder (!%p3585_p3), %s3580_s23, 0 }
  0x5e   : > { %464 = sbr.rel (%p3585_p3) target bundleno = 1375 (0x55f), region = 72 }
  0x63   : > { %3152 = dma.done.wait (%p3586_p0), [#allocation4], 64  }
  0x64   : > { %3154 = vsyncadd (%p3586_p0), [#allocation4], 4294967232 }
  0x65   : > { %3156 = dma.done.wait (%p3586_p0), [#allocation7], 1024  }
  0x66   : > { %3158 = vsyncadd (%p3586_p0), [#allocation7], 4294966272 }
  0x67   : > { %3160 = dma.done.wait (%p3586_p0), [#allocation10], 16384  }
  0x68   : > { %3162 = vsyncadd (%p3586_p0), [#allocation10], 4294950912  ;;  %p528_p13 = scmp.lt.s32.totalorder %s3181_s28, 1  ;;  %v3200_v0 = vmov 1   ;;  %v3201_v1 = vmov 0   ;;  %v3202_v3 = vmov 0.0  }
  0x69   : > { %2892 = vset.pattern.permute.xlu1 %v3200_v0  ;;  %2891 = vset.pattern.permute.xlu0 %v3201_v1  ;;  %v2895_v5 = vld [vmem:[%s3542_s3 + $0x18] sm:$0xff]   ;;  %v2896_v6 = vld [vmem:[%s3542_s3 + $0x10] sm:$0xff]   ;;  %v2897_v7 = vld [vmem:[%s3542_s3 + $0x8] sm:$0xff]   ;;  %v3203_v8 = vmov 2   ;;  %vm3204_vm0 = vmmov 0   ;;  %vm642_vm1 = vcmask 523264  }
  0x6a   : > { %s529_s22 = scalar_select %p528_p13, %s3181_s28, 1  ;;  %2739 = vmatprep.subr.bf16.mxu0 %v3202_v3  ;;  %2751 = vmatprep.subr.bf16.mxu1 %v3202_v3  ;;  %v2898_v9 = vld [vmem:[%s3542_s3] sm:$0xff]   ;;  %v2900_v36 = vld [vmem:[#allocation6 + $0x10] sm:$0xff]   ;;  %v2901_v37 = vld [vmem:[#allocation6 + $0x8] sm:$0xff]  }
  0x6b   : > { %2740 = vmatpush3.bf16.msra.mxu0 %v2895_v5  ;;  %2747 = vmatprep.mubr.msk.bf16.mxu0 %vm3204_vm0, %v3202_v3  ;;  %v2899_v10 = vld [vmem:[#allocation6 + $0x18] sm:$0xff]   ;;  %v2902_v38 = vld [vmem:[#allocation6] sm:$0xff]   ;;  %v2904_v50 = vld [vmem:[#allocation8 + $0x10] sm:$0xff]   ;;  %s525_s27 = sand.u32 1, %s3173_s26   ;;  %s2632_s21 = sshll.u32 %s3181_s28, 4 }
  0x6c   : > { %s2635_s19 = sshll.u32 %s529_s22, 4  ;;  %2741 = vmatprep.subr.bf16.mxu0 %v3202_v3  ;;  %2759 = vmatprep.mubr.msk.bf16.mxu1 %vm3204_vm0, %v3202_v3  ;;  %v2483_v13 = vld [vmem:[#allocation3 + $0x1] ss:$0 sm:$0xff]  ;;  %v2482_v14 = vld [vmem:[#allocation3] ss:$0 sm:$0xff]  ;;  %v2905_v51 = vld [vmem:[#allocation8 + $0x8] sm:$0xff]  }
  0x6d   : > { %s535_s25 = scalar_lea.vmem %s3539_s0, %s2635_s19  ;;  %2752 = vmatpush3.bf16.msra.mxu1 %v2899_v10  ;;  %v2484_v21 = vld [vmem:[#allocation3 + $0x2] ss:$0 sm:$0xff]  ;;  %v2485_v28 = vld [vmem:[%s3541_s2] ss:$0 sm:$0xff]  ;;  %v2906_v52 = vld [vmem:[#allocation8] sm:$0xff]   ;;  %s526_s15 = scalar_lea.vmem [#allocation12], %s525_s27 }
  0x6e   : > { %v538_v2 = vld [vmem:[%s535_s25] sm:$0xff]  ;;  %v539_v4 = vld [vmem:[%s535_s25 + $0x8] sm:$0xff]  ;;  %2753 = vmatprep.subr.bf16.mxu1 %v3202_v3  ;;  %s2346_s20 = sshll.u32 %s526_s15, 4  ;;  %s3587_s19 = sld [smem:[#allocation24_spill]]  ;;  %s2347_s20 = int_to_ptr.vmem [resolvable:$true] %s2346_s20 }
  0x6f   : > { %559 = vperm.xlu1 %2892, %v538_v2   ;;  %543 = vperm.xlu0 %2891, %v538_v2   ;;  %v2903_v39 = vld [vmem:[#allocation8 + $0x18] sm:$0xff]   ;;  %v918_v53 = vld [vmem:[#allocation9 + $0x1c0] sm:$0xff]  ;;  %v919_v55 = vld [vmem:[#allocation9 + $0x1c8] sm:$0xff]  ;;  %s2334_s13 = scalar_lea.sflag [#allocation5], %s525_s27  ;;  %s3101_s25 = scalar_lea.vmem %s2347_s20, 16 }
  0x70   : > { %2742 = vmatpush3.bf16.msra.mxu0 %v2896_v6  ;;  %v2486_v40 = vld [vmem:[%s3543_s4] ss:$0 sm:$0xff]  ;;  %v922_v54 = vld [vmem:[#allocation9 + $0x1e0] sm:$0xff]  ;;  %v923_v58 = vld [vmem:[#allocation9 + $0x1e8] sm:$0xff]  ;;  %p3102_p6 = scmp.ne.s32.totalorder %s2347_s20, %s3101_s25  ;;  %p3588_p7 = scmp.ne.s32.totalorder %s3575_s18, 0 }
  0x71   : > { %2743 = vmatprep.subr.bf16.mxu0 %v3202_v3  ;;  %2754 = vmatpush3.bf16.msra.mxu1 %v2900_v36  ;;  %v2560_v56 = vcombine.low %v918_v53, %v922_v54  ;;  %v2561_v57 = vcombine.high %v918_v53, %v922_v54  ;;  %v910_v59 = vld [vmem:[#allocation9 + $0x180] sm:$0xff]  ;;  %v2562_v61 = vcombine.low %v919_v55, %v923_v58  ;;  %v899_v36 = vld [vmem:[#allocation9 + $0x128] sm:$0xff]  ;;  %s3206_s23 = smov [#allocation12]  }
  0x72   : > { %2755 = vmatprep.subr.bf16.mxu1 %v3202_v3  ;;  %v914_v60 = vld [vmem:[#allocation9 + $0x1a0] sm:$0xff]  ;;  %v2563_v62 = vcombine.high %v919_v55, %v923_v58  ;;  %v863_v58 = vld [vmem:[#allocation9 + $0x8] sm:$0xff]  ;;  %p3103_p9 = pnand %p3102_p6, %p3588_p7  ;;  %s3105_s30 = sshll.u32 %s3206_s23, 4  ;;  %s3106_s30 = int_to_ptr.vmem [resolvable:$false] %s3105_s30 }
  0x73   : > { %563 = vperm.xlu1 %2892, %v539_v4   ;;  %548 = vperm.xlu0 %2891, %v539_v4   ;;  %v2553_v63 = vcombine.high %v910_v59, %v914_v60  ;;  %v2552_v0 = vcombine.low %v910_v59, %v914_v60  ;;  %v894_v6 = vld [vmem:[#allocation9 + $0x100] sm:$0xff]  ;;  %v867_v60 = vld [vmem:[#allocation9 + $0x28] sm:$0xff]  ;;  %s3107_s28 = scalar_lea.vmem %s3106_s30, 32  ;;  %p3108_p8 = scmp.lt.s32.totalorder %s2347_s20, %s3106_s30 }
  0x74   : > { %2744 = vmatpush3.bf16.msra.mxu0 %v2897_v7  ;;  %v898_v7 = vld [vmem:[#allocation9 + $0x120] sm:$0xff]  ;;  %s2344_s14 = scalar_lea.hbm %s3587_s19, %s2632_s21  ;;  %p3104_p12 = pneg %p3103_p9 }
  0x75   : > { %2745 = vmatprep.subr.bf16.mxu0 %v3202_v3  ;;  %2756 = vmatpush3.bf16.msra.mxu1 %v2901_v37  ;;  %v886_v10 = vld [vmem:[#allocation9 + $0xc0] sm:$0xff]  ;;  %p3109_p1 = scmp.lt.s32.totalorder %s3107_s28, %s3101_s25 }
  0x76   : > { %2757 = vmatprep.subr.bf16.mxu1 %v3202_v3 }
  0x77   : > { %2894 = vset.pattern.permute.xlu1 %v3203_v8  ;;  %2893 = vset.pattern.permute.xlu0 %v3203_v8  ;;  %v2537_v8 = vcombine.high %v894_v6, %v898_v7  ;;  %p3110_p2 = por %p3109_p1, %p3108_p8 }
  0x78   : > { %580 = vperm.xlu1 %2894, %v539_v4   ;;  %576 = vperm.xlu0 %2893, %v538_v2   ;;  %v902_v2 = vld [vmem:[#allocation9 + $0x140] sm:$0xff] }
  0x79   : > { %2746 = vmatpush3.bf16.msra.mxu0 %v2898_v9  ;;  %2758 = vmatpush3.bf16.msra.mxu1 %v2902_v38  ;;  %v2536_v9 = vcombine.low %v894_v6, %v898_v7  ;;  %p3111_p4 = pnand %p3110_p2, %p3104_p12 }
  0x7a   : > { %2763 = vmatprep.subr.bf16.mxu0 %v3202_v3  ;;  %1246 = vmatprep.subr.bf16.mxu1 %v2561_v57  ;;  %v866_v57 = vld [vmem:[#allocation9 + $0x20] sm:$0xff] }
  0xea   : > { %v560_v11 = vpop.permute.xlu1 %559  ;;  %v544_v12 = vpop.permute.xlu0 %543 }
  0xeb   : > { %v570_v17 = vmul.f32 %v2483_v13, %v560_v11  ;;  %v555_v18 = vmul.f32 %v2482_v14, %v544_v12  ;;  %v890_v11 = vld [vmem:[#allocation9 + $0xe0] sm:$0xff] }
  0xec   : > { %v2529_v12 = vcombine.high %v886_v10, %v890_v11 }
  0xed   : > { %v572_v24 = vadd.f32 %v570_v17, %v555_v18  ;;  %v2492_v18 = vld [vmem:[%s3545_s6] ss:$0 sm:$0xff] }
  0xee   : > { %v564_v15 = vpop.permute.xlu1 %563  ;;  %v549_v16 = vpop.permute.xlu0 %548 }
  0xef   : > { %v571_v19 = vmul.f32 %v2483_v13, %v564_v15  ;;  %v556_v20 = vmul.f32 %v2482_v14, %v549_v16  ;;  %v2528_v13 = vcombine.low %v886_v10, %v890_v11  ;;  %v878_v14 = vld [vmem:[#allocation9 + $0x80] sm:$0xff] }
  0xf0   : > { %v882_v15 = vld [vmem:[#allocation9 + $0xa0] sm:$0xff] }
  0xf1   : > { %v573_v25 = vadd.f32 %v571_v19, %v556_v20  ;;  %v2521_v16 = vcombine.high %v878_v14, %v882_v15  ;;  %v2520_v17 = vcombine.low %v878_v14, %v882_v15  ;;  %v912_v15 = vld [vmem:[#allocation9 + $0x190] sm:$0xff] }
  0xf3   : > { %v581_v22 = vpop.permute.xlu1 %580  ;;  %v577_v23 = vpop.permute.xlu0 %576 }
  0xf4   : > { %v588_v26 = vmul.f32 %v2484_v21, %v581_v22  ;;  %v587_v27 = vmul.f32 %v2484_v21, %v577_v23 }
  0xf6   : > { %v590_v29 = vadd.f32 %v588_v26, %v573_v25  ;;  %v589_v30 = vadd.f32 %v587_v27, %v572_v24  ;;  %v911_v25 = vld [vmem:[#allocation9 + $0x188] sm:$0xff] }
  0xf7   : > { %v915_v26 = vld [vmem:[#allocation9 + $0x1a8] sm:$0xff] }
  0xf8   : > { %v599_v31 = vadd.f32 %v2485_v28, %v590_v29  ;;  %v598_v32 = vadd.f32 %v2485_v28, %v589_v30  ;;  %v2555_v30 = vcombine.high %v911_v25, %v915_v26 }
  0xfa   : > { %v601_v33 = vmax.f32 %v599_v31, 0.0  ;;  %v600_v34 = vmax.f32 %v598_v32, 0.0  ;;  %v903_v31 = vld [vmem:[#allocation9 + $0x148] sm:$0xff] }
  0xfb   : > { %v907_v32 = vld [vmem:[#allocation9 + $0x168] sm:$0xff] }
  0xfc   : > { %v602_v35 = vpack.c.bf16 %v601_v33, %v600_v34  ;;  %v2554_v33 = vcombine.low %v911_v25, %v915_v26  ;;  %v2547_v34 = vcombine.high %v903_v31, %v907_v32  ;;  %v2546_v37 = vcombine.low %v903_v31, %v907_v32  ;;  %v904_v25 = vld [vmem:[#allocation9 + $0x150] sm:$0xff] }
  0xfd   : > { %v908_v26 = vld [vmem:[#allocation9 + $0x170] sm:$0xff] }
  0xfe   : > { %2748 = vmatmul.mubr.msk.bf16.vlgmr.msra.gmra.mxu0 %vm642_vm1, %v602_v35  ;;  %v895_v35 = vld [vmem:[#allocation9 + $0x108] sm:$0xff]  ;;  %v2549_v31 = vcombine.high %v904_v25, %v908_v26 }
  0xff   : > { %2771 = vmatprep.mubr.msk.bf16.mxu0 %vm3204_vm0, %v3202_v3  ;;  %2764 = vmatpush3.bf16.msra.mxu0 %v2903_v39  ;;  %v2539_v38 = vcombine.high %v895_v35, %v899_v36  ;;  %v887_v39 = vld [vmem:[#allocation9 + $0xc8] sm:$0xff] }
 0x100   : > { %2765 = vmatprep.subr.bf16.mxu0 %v3202_v3 }
 0x103   : > { %2766 = vmatpush3.bf16.msra.mxu0 %v2904_v50  ;;  %v871_v50 = vld [vmem:[#allocation9 + $0x48] sm:$0xff] }
 0x104   : > { %2767 = vmatprep.subr.bf16.mxu0 %v3202_v3 }
 0x107   : > { %2768 = vmatpush3.bf16.msra.mxu0 %v2905_v51 }
 0x108   : > { %2769 = vmatprep.subr.bf16.mxu0 %v3202_v3  ;;  %v906_v3 = vld [vmem:[#allocation9 + $0x160] sm:$0xff] }
 0x109   : > { %v2545_v4 = vcombine.high %v902_v2, %v906_v3  ;;  %v2544_v5 = vcombine.low %v902_v2, %v906_v3  ;;  %v924_v2 = vld [vmem:[#allocation9 + $0x1f0] sm:$0xff]  ;;  %v921_v3 = vld [vmem:[#allocation9 + $0x1d8] sm:$0xff] }
 0x10b   : > { %2770 = vmatpush3.bf16.msra.mxu0 %v2906_v52  ;;  %v875_v52 = vld [vmem:[#allocation9 + $0x68] sm:$0xff] }
 0x10c   : > { %1289 = vmatprep.subr.bf16.mxu0 %v2563_v62  ;;  %v2514_v54 = vcombine.low %v871_v50, %v875_v52  ;;  %v2515_v55 = vcombine.high %v871_v50, %v875_v52  ;;  %v2506_v62 = vcombine.low %v863_v58, %v867_v60  ;;  %v881_v50 = vld [vmem:[#allocation9 + $0x98] sm:$0xff] }
 0x1be   : > { %v680_v41 = vpop.f32.mrf.mxu0 }
 0x1bf   : > { %v681_v43 = vadd.f32 %v2486_v40, %v680_v41  ;;  %v2538_v41 = vcombine.low %v895_v35, %v899_v36  ;;  %v897_v35 = vld [vmem:[#allocation9 + $0x118] sm:$0xff] }
 0x1c0   : > { %v2749_v42 = vpop.f32.mrf.mxu0  ;;  %v901_v36 = vld [vmem:[#allocation9 + $0x138] sm:$0xff] }
 0x1c1   : > { %v687_v47 = vmax.f32 %v681_v43, 0.0  ;;  %v879_v43 = vld [vmem:[#allocation9 + $0x88] sm:$0xff] }
 0x1c2   : > { %v683_v44 = vpop.f32.mrf.mxu0 }
 0x1c3   : > { %v684_v45 = vadd.f32 %v2486_v40, %v683_v44  ;;  %v891_v40 = vld [vmem:[#allocation9 + $0xe8] sm:$0xff] }
 0x1c4   : > { %v2750_v46 = vpop.f32.mrf.mxu0  ;;  %v2531_v42 = vcombine.high %v887_v39, %v891_v40  ;;  %v883_v44 = vld [vmem:[#allocation9 + $0xa8] sm:$0xff] }
 0x1c5   : > { %v688_v48 = vmax.f32 %v684_v45, 0.0  ;;  %v2530_v45 = vcombine.low %v887_v39, %v891_v40  ;;  %v2523_v46 = vcombine.high %v879_v43, %v883_v44  ;;  %v2543_v40 = vcombine.high %v897_v35, %v901_v36 }
 0x1c7   : > { %v689_v49 = vpack.c.bf16 %v688_v48, %v687_v47  ;;  %v2522_v47 = vcombine.low %v879_v43, %v883_v44  ;;  %v870_v48 = vld [vmem:[#allocation9 + $0x40] sm:$0xff]  ;;  %v889_v43 = vld [vmem:[#allocation9 + $0xd8] sm:$0xff] }
 0x1c8   : > { %v893_v44 = vld [vmem:[#allocation9 + $0xf8] sm:$0xff] }
 0x1c9   : > { %2760 = vmatmul.mubr.msk.bf16.vlgmr.msra.gmra.mxu1 %vm642_vm1, %v689_v49  ;;  %v874_v49 = vld [vmem:[#allocation9 + $0x60] sm:$0xff] }
 0x1ca   : > { %1278 = vmatprep.mubr.bf16.mxu1 %v3201_v1  ;;  %1247 = vmatpush1.bf16.msra.mxu1 %v2560_v56  ;;  %v2513_v51 = vcombine.high %v870_v48, %v874_v49  ;;  %v2512_v53 = vcombine.low %v870_v48, %v874_v49  ;;  %v862_v56 = vld [vmem:[#allocation9] sm:$0xff]  ;;  %v880_v48 = vld [vmem:[#allocation9 + $0x90] sm:$0xff] }
 0x1cb   : > { %1248 = vmatprep.subr.bf16.mxu1 %v2553_v63  ;;  %v2505_v59 = vcombine.high %v862_v56, %v866_v57  ;;  %v2507_v63 = vcombine.high %v863_v58, %v867_v60  ;;  %v884_v49 = vld [vmem:[#allocation9 + $0xb0] sm:$0xff]  ;;  %v873_v58 = vld [vmem:[#allocation9 + $0x58] sm:$0xff] }
 0x1cc   : > { %v2524_v60 = vcombine.low %v880_v48, %v884_v49 }
 0x1ce   : > { %1249 = vmatpush1.bf16.msra.mxu1 %v2552_v0  ;;  %v920_v0 = vld [vmem:[#allocation9 + $0x1d0] sm:$0xff] }
 0x1cf   : > { %1250 = vmatprep.subr.bf16.mxu1 %v2545_v4  ;;  %v2565_v4 = vcombine.high %v920_v0, %v924_v2  ;;  %v2564_v6 = vcombine.low %v920_v0, %v924_v2  ;;  %v864_v0 = vld [vmem:[#allocation9 + $0x10] sm:$0xff] }
 0x1d0   : > { %v868_v2 = vld [vmem:[#allocation9 + $0x30] sm:$0xff] }
 0x1d2   : > { %1251 = vmatpush1.bf16.msra.mxu1 %v2544_v5  ;;  %v925_v5 = vld [vmem:[#allocation9 + $0x1f8] sm:$0xff] }
 0x1d3   : > { %1252 = vmatprep.subr.bf16.mxu1 %v2537_v8  ;;  %v2566_v7 = vcombine.low %v921_v3, %v925_v5  ;;  %v2567_v8 = vcombine.high %v921_v3, %v925_v5  ;;  %v865_v3 = vld [vmem:[#allocation9 + $0x18] sm:$0xff] }
 0x1d6   : > { %1253 = vmatpush1.bf16.msra.mxu1 %v2536_v9  ;;  %v2498_v9 = vld [vmem:[%s3547_s8] ss:$0 sm:$0xff] }
 0x1d7   : > { %1254 = vmatprep.subr.bf16.mxu1 %v2529_v12 }
 0x1da   : > { %1255 = vmatpush1.bf16.msra.mxu1 %v2528_v13 }
 0x1db   : > { %1256 = vmatprep.subr.bf16.mxu1 %v2521_v16 }
 0x1de   : > { %1257 = vmatpush1.bf16.msra.mxu1 %v2520_v17  ;;  %v916_v17 = vld [vmem:[#allocation9 + $0x1b0] sm:$0xff] }
 0x1df   : > { %1258 = vmatprep.subr.bf16.mxu1 %v2513_v51  ;;  %v885_v51 = vld [vmem:[#allocation9 + $0xb8] sm:$0xff] }
 0x1e2   : > { %1259 = vmatpush1.bf16.msra.mxu1 %v2512_v53  ;;  %v2534_v53 = vcombine.low %v889_v43, %v893_v44 }
 0x1e3   : > { %1260 = vmatprep.subr.bf16.mxu1 %v2505_v59  ;;  %v877_v59 = vld [vmem:[#allocation9 + $0x78] sm:$0xff] }
 0x289   : > { %v766_v19 = vpop.f32.mrf.mxu1 }
 0x28a   : > { %v767_v21 = vadd.f32 %v2492_v18, %v766_v19  ;;  %v917_v19 = vld [vmem:[#allocation9 + $0x1b8] sm:$0xff] }
 0x28b   : > { %v2761_v20 = vpop.f32.mrf.mxu1 }
 0x28c   : > { %v773_v27 = vmax.f32 %v767_v21, 0.0 }
 0x28d   : > { %v769_v22 = vpop.f32.mrf.mxu1 }
 0x28e   : > { %v770_v23 = vadd.f32 %v2492_v18, %v769_v22  ;;  %v913_v18 = vld [vmem:[#allocation9 + $0x198] sm:$0xff] }
 0x28f   : > { %v2762_v24 = vpop.f32.mrf.mxu1 }
 0x290   : > { %v774_v28 = vmax.f32 %v770_v23, 0.0  ;;  %v2557_v23 = vcombine.high %v912_v15, %v916_v17  ;;  %v2559_v24 = vcombine.high %v913_v18, %v917_v19 }
 0x292   : > { %v775_v29 = vpack.c.bf16 %v774_v28, %v773_v27  ;;  %v905_v27 = vld [vmem:[#allocation9 + $0x158] sm:$0xff] }
 0x293   : > { %v909_v28 = vld [vmem:[#allocation9 + $0x178] sm:$0xff] }
 0x294   : > { %2772 = vmatmul.mubr.msk.bf16.vlgmr.msra.gmra.mxu0 %vm642_vm1, %v775_v29  ;;  %v2556_v29 = vcombine.low %v912_v15, %v916_v17  ;;  %v2551_v32 = vcombine.high %v905_v27, %v909_v28  ;;  %v2911_v15 = vld [vmem:[#allocation11 + $0x70] sm:$0xff]  }
 0x295   : > { %1290 = vmatpush1.bf16.msra.mxu0 %v2562_v61  ;;  %1321 = vmatprep.mubr.bf16.mxu0 %v3201_v1  ;;  %v2504_v61 = vcombine.low %v862_v56, %v866_v57  ;;  %v872_v56 = vld [vmem:[#allocation9 + $0x50] sm:$0xff] }
 0x296   : > { %1291 = vmatprep.subr.bf16.mxu0 %v2555_v30  ;;  %v2558_v30 = vcombine.low %v913_v18, %v917_v19  ;;  %v876_v57 = vld [vmem:[#allocation9 + $0x70] sm:$0xff]  ;;  %v2915_v19 = vld [vmem:[#allocation11 + $0x68] sm:$0xff]  }
 0x297   : > { %1261 = vmatpush1.bf16.msra.mxu1 %v2504_v61  ;;  %v2526_v61 = vcombine.low %v881_v50, %v885_v51  ;;  %v2516_v5 = vcombine.low %v872_v56, %v876_v57  ;;  %v2913_v17 = vld [vmem:[#allocation11 + $0x30] sm:$0xff]  }
 0x298   : > { %1332 = vmatprep.subr.bf16.mxu1 %v2565_v4  ;;  %v869_v4 = vld [vmem:[#allocation9 + $0x38] sm:$0xff]  ;;  %v2914_v18 = vld [vmem:[#allocation11 + $0xb0] sm:$0xff]  }
 0x299   : > { %1292 = vmatpush1.bf16.msra.mxu0 %v2554_v33  ;;  %v896_v33 = vld [vmem:[#allocation9 + $0x110] sm:$0xff] }
 0x29a   : > { %1293 = vmatprep.subr.bf16.mxu0 %v2547_v34  ;;  %v900_v34 = vld [vmem:[#allocation9 + $0x130] sm:$0xff] }
 0x29b   : > { %v2541_v39 = vcombine.high %v896_v33, %v900_v34 }
 0x29d   : > { %1294 = vmatpush1.bf16.msra.mxu0 %v2546_v37  ;;  %v2548_v37 = vcombine.low %v904_v25, %v908_v26  ;;  %v2921_v25 = vld [vmem:[#allocation11 + $0x20] sm:$0xff]  }
 0x29e   : > { %1295 = vmatprep.subr.bf16.mxu0 %v2539_v38  ;;  %v2550_v38 = vcombine.low %v905_v27, %v909_v28  ;;  %v2922_v26 = vld [vmem:[#allocation11 + $0xa0] sm:$0xff]   ;;  %v2923_v27 = vld [vmem:[#allocation11 + $0x58] sm:$0xff]  }
 0x29f   : > { %v2924_v28 = vld [vmem:[#allocation11 + $0xd8] sm:$0xff]  }
 0x2a1   : > { %1296 = vmatpush1.bf16.msra.mxu0 %v2538_v41  ;;  %v888_v41 = vld [vmem:[#allocation9 + $0xd0] sm:$0xff] }
 0x2a2   : > { %1297 = vmatprep.subr.bf16.mxu0 %v2531_v42  ;;  %v892_v42 = vld [vmem:[#allocation9 + $0xf0] sm:$0xff] }
 0x2a3   : > { %v2532_v52 = vcombine.low %v888_v41, %v892_v42 }
 0x2a5   : > { %1298 = vmatpush1.bf16.msra.mxu0 %v2530_v45  ;;  %v2540_v45 = vcombine.low %v896_v33, %v900_v34  ;;  %v2929_v33 = vld [vmem:[#allocation11 + $0x10] sm:$0xff]  }
 0x2a6   : > { %1299 = vmatprep.subr.bf16.mxu0 %v2523_v46  ;;  %v2542_v46 = vcombine.low %v897_v35, %v901_v36  ;;  %v2930_v34 = vld [vmem:[#allocation11 + $0x90] sm:$0xff]   ;;  %v2931_v35 = vld [vmem:[#allocation11 + $0x48] sm:$0xff]  }
 0x2a7   : > { %v2932_v36 = vld [vmem:[#allocation11 + $0xc8] sm:$0xff]  }
 0x2a9   : > { %1300 = vmatpush1.bf16.msra.mxu0 %v2522_v47  ;;  %v2533_v47 = vcombine.high %v888_v41, %v892_v42  ;;  %v2937_v41 = vld [vmem:[#allocation11] sm:$0xff]  }
 0x2aa   : > { %1301 = vmatprep.subr.bf16.mxu0 %v2515_v55  ;;  %v2527_v55 = vcombine.high %v881_v50, %v885_v51  ;;  %v2938_v42 = vld [vmem:[#allocation11 + $0x80] sm:$0xff]  }
 0x2ad   : > { %1302 = vmatpush1.bf16.msra.mxu0 %v2514_v54  ;;  %v2525_v54 = vcombine.high %v880_v48, %v884_v49 }
 0x2ae   : > { %1303 = vmatprep.subr.bf16.mxu0 %v2507_v63  ;;  %v2519_v63 = vcombine.high %v873_v58, %v877_v59 }
 0x2b1   : > { %1304 = vmatpush1.bf16.msra.mxu0 %v2506_v62  ;;  %v2517_v62 = vcombine.high %v872_v56, %v876_v57 }
 0x2b2   : > { %1375 = vmatprep.subr.bf16.mxu0 %v2567_v8  ;;  %v2511_v8 = vcombine.high %v865_v3, %v869_v4 }
 0x354   : > { %v852_v10 = vpop.f32.mrf.mxu0 }
 0x355   : > { %v853_v12 = vadd.f32 %v2498_v9, %v852_v10  ;;  %v2510_v10 = vcombine.low %v865_v3, %v869_v4 }
 0x356   : > { %v2773_v11 = vpop.f32.mrf.mxu0 }
 0x357   : > { %v859_v20 = vmax.f32 %v853_v12, 0.0  ;;  %v2907_v11 = vld [vmem:[#allocation11 + $0x78] sm:$0xff]  }
 0x358   : > { %v855_v13 = vpop.f32.mrf.mxu0  ;;  %v2908_v12 = vld [vmem:[#allocation11 + $0xf8] sm:$0xff]  }
 0x359   : > { %v856_v14 = vadd.f32 %v2498_v9, %v855_v13  ;;  %v2508_v9 = vcombine.low %v864_v0, %v868_v2  ;;  %v2909_v13 = vld [vmem:[#allocation11 + $0x38] sm:$0xff]  }
 0x35a   : > { %v2774_v16 = vpop.f32.mrf.mxu0 }
 0x35b   : > { %v860_v21 = vmax.f32 %v856_v14, 0.0  ;;  %v2910_v14 = vld [vmem:[#allocation11 + $0xb8] sm:$0xff]   ;;  %v2912_v16 = vld [vmem:[#allocation11 + $0xf0] sm:$0xff]  }
 0x35d   : > { %v3465_v22 = vpack.c.bf16 %v860_v21, %v859_v20  ;;  %v2916_v20 = vld [vmem:[#allocation11 + $0xe8] sm:$0xff]  }
 0x35e   : > { %v2917_v21 = vld [vmem:[#allocation11 + $0x28] sm:$0xff]  }
 0x35f   : > { %1279 = vmatmul.mubr.bf16.vlgmr.msra.gmra.mxu1 %v3465_v22  ;;  %1322 = vmatmul.mubr.bf16.vlgmr.msra.gmra.mxu0 %v3465_v22 }
 0x360   : > { %1333 = vmatpush1.bf16.msra.mxu1 %v2564_v6  ;;  %1376 = vmatpush1.bf16.msra.mxu0 %v2566_v7  ;;  %v2518_v6 = vcombine.low %v873_v58, %v877_v59  ;;  %v2509_v7 = vcombine.high %v864_v0, %v868_v2 }
 0x361   : > { %1334 = vmatprep.subr.bf16.mxu1 %v2557_v23  ;;  %1377 = vmatprep.subr.bf16.mxu0 %v2559_v24  ;;  %v2919_v23 = vld [vmem:[#allocation11 + $0x60] sm:$0xff]  }
 0x362   : > { %1364 = vmatprep.mubr.bf16.mxu1 %v3201_v1  ;;  %1407 = vmatprep.mubr.bf16.mxu0 %v3201_v1  ;;  %v2535_v1 = vcombine.high %v889_v43, %v893_v44  ;;  %v2920_v24 = vld [vmem:[#allocation11 + $0xe0] sm:$0xff]   ;;  %v2939_v43 = vld [vmem:[#allocation11 + $0x178] sm:$0xff]  }
 0x363   : > { %v2940_v44 = vld [vmem:[#allocation11 + $0x1f8] sm:$0xff]  }
 0x364   : > { %1335 = vmatpush1.bf16.msra.mxu1 %v2556_v29  ;;  %1378 = vmatpush1.bf16.msra.mxu0 %v2558_v30  ;;  %v2925_v29 = vld [vmem:[#allocation11 + $0x18] sm:$0xff]  }
 0x365   : > { %1336 = vmatprep.subr.bf16.mxu1 %v2549_v31  ;;  %1379 = vmatprep.subr.bf16.mxu0 %v2551_v32  ;;  %v2926_v30 = vld [vmem:[#allocation11 + $0x98] sm:$0xff]   ;;  %v2927_v31 = vld [vmem:[#allocation11 + $0x50] sm:$0xff]  }
 0x366   : > { %v2928_v32 = vld [vmem:[#allocation11 + $0xd0] sm:$0xff]  }
 0x368   : > { %1337 = vmatpush1.bf16.msra.mxu1 %v2548_v37  ;;  %1380 = vmatpush1.bf16.msra.mxu0 %v2550_v38  ;;  %v2933_v37 = vld [vmem:[#allocation11 + $0x8] sm:$0xff]  }
 0x369   : > { %1338 = vmatprep.subr.bf16.mxu1 %v2541_v39  ;;  %1381 = vmatprep.subr.bf16.mxu0 %v2543_v40  ;;  %v2934_v38 = vld [vmem:[#allocation11 + $0x88] sm:$0xff]   ;;  %v2935_v39 = vld [vmem:[#allocation11 + $0x40] sm:$0xff]  }
 0x36a   : > { %v2936_v40 = vld [vmem:[#allocation11 + $0xc0] sm:$0xff]  }
 0x36c   : > { %1339 = vmatpush1.bf16.msra.mxu1 %v2540_v45  ;;  %1382 = vmatpush1.bf16.msra.mxu0 %v2542_v46 }
 0x36d   : > { %1340 = vmatprep.subr.bf16.mxu1 %v2533_v47  ;;  %1383 = vmatprep.subr.bf16.mxu0 %v2535_v1 }
 0x370   : > { %1341 = vmatpush1.bf16.msra.mxu1 %v2532_v52  ;;  %1384 = vmatpush1.bf16.msra.mxu0 %v2534_v53 }
 0x371   : > { %1342 = vmatprep.subr.bf16.mxu1 %v2525_v54  ;;  %1385 = vmatprep.subr.bf16.mxu0 %v2527_v55 }
 0x374   : > { %1343 = vmatpush1.bf16.msra.mxu1 %v2524_v60  ;;  %1386 = vmatpush1.bf16.msra.mxu0 %v2526_v61 }
 0x375   : > { %1344 = vmatprep.subr.bf16.mxu1 %v2517_v62  ;;  %1387 = vmatprep.subr.bf16.mxu0 %v2519_v63 }
 0x378   : > { %1345 = vmatpush1.bf16.msra.mxu1 %v2516_v5  ;;  %1388 = vmatpush1.bf16.msra.mxu0 %v2518_v6 }
 0x379   : > { %1346 = vmatprep.subr.bf16.mxu1 %v2509_v7  ;;  %1389 = vmatprep.subr.bf16.mxu0 %v2511_v8 }
 0x37c   : > { %1347 = vmatpush1.bf16.msra.mxu1 %v2508_v9  ;;  %1390 = vmatpush1.bf16.msra.mxu0 %v2510_v10 }
 0x37d   : > { %2651 = vmatprep.subr.bf16.mxu1 %v2907_v11  ;;  %2673 = vmatprep.subr.bf16.mxu0 %v2908_v12 }
 0x37f   : > { %1365 = vmatmul.mubr.bf16.vlgmr.msra.gmra.mxu1 %v3465_v22  ;;  %1408 = vmatmul.mubr.bf16.vlgmr.msra.gmra.mxu0 %v3465_v22  ;;  %v2918_v22 = vld [vmem:[#allocation11 + $0xa8] sm:$0xff]  }
 0x380   : > { %2652 = vmatpush3.bf16.msra.mxu1 %v2909_v13  ;;  %2674 = vmatpush3.bf16.msra.mxu0 %v2910_v14 }
 0x381   : > { %2653 = vmatprep.subr.bf16.mxu1 %v2911_v15  ;;  %2675 = vmatprep.subr.bf16.mxu0 %v2912_v16 }
 0x384   : > { %2654 = vmatpush3.bf16.msra.mxu1 %v2913_v17  ;;  %2676 = vmatpush3.bf16.msra.mxu0 %v2914_v18  ;;  %v3205_v18 = vmov 1966171168  }
 0x385   : > { %2655 = vmatprep.subr.bf16.mxu1 %v2915_v19  ;;  %2677 = vmatprep.subr.bf16.mxu0 %v2916_v20  ;;  %v1491_v19 = vunpack.c.l.s4 %v3205_v18  ;;  %v1493_v20 = vlaneseq }
 0x388   : > { %2656 = vmatpush3.bf16.msra.mxu1 %v2917_v21  ;;  %2678 = vmatpush3.bf16.msra.mxu0 %v2918_v22 }
 0x389   : > { %2657 = vmatprep.subr.bf16.mxu1 %v2919_v23  ;;  %2679 = vmatprep.subr.bf16.mxu0 %v2920_v24 }
 0x38c   : > { %2658 = vmatpush3.bf16.msra.mxu1 %v2921_v25  ;;  %2680 = vmatpush3.bf16.msra.mxu0 %v2922_v26 }
 0x38d   : > { %2659 = vmatprep.subr.bf16.mxu1 %v2923_v27  ;;  %2681 = vmatprep.subr.bf16.mxu0 %v2924_v28 }
 0x390   : > { %2660 = vmatpush3.bf16.msra.mxu1 %v2925_v29  ;;  %2682 = vmatpush3.bf16.msra.mxu0 %v2926_v30 }
 0x391   : > { %2661 = vmatprep.subr.bf16.mxu1 %v2927_v31  ;;  %2683 = vmatprep.subr.bf16.mxu0 %v2928_v32 }
 0x394   : > { %2662 = vmatpush3.bf16.msra.mxu1 %v2929_v33  ;;  %2684 = vmatpush3.bf16.msra.mxu0 %v2930_v34 }
 0x395   : > { %2663 = vmatprep.subr.bf16.mxu1 %v2931_v35  ;;  %2685 = vmatprep.subr.bf16.mxu0 %v2932_v36  ;;  %v1492_v35 = vunpack.c.0.s8 %v1491_v19  ;;  %v3473_v36 = vshrl.u32 %v1493_v20, 7 }
 0x398   : > { %2664 = vmatpush3.bf16.msra.mxu1 %v2933_v37  ;;  %2686 = vmatpush3.bf16.msra.mxu0 %v2934_v38 }
 0x399   : > { %2665 = vmatprep.subr.bf16.mxu1 %v2935_v39  ;;  %2687 = vmatprep.subr.bf16.mxu0 %v2936_v40 }
 0x39c   : > { %2666 = vmatpush3.bf16.msra.mxu1 %v2937_v41  ;;  %2688 = vmatpush3.bf16.msra.mxu0 %v2938_v42 }
 0x39d   : > { %2695 = vmatprep.subr.bf16.mxu1 %v2939_v43  ;;  %2717 = vmatprep.subr.bf16.mxu0 %v2940_v44 }
 0x41f   : > { %v1280_v45 = vpop.f32.mrf.mxu1  ;;  %v1323_v46 = vpop.f32.mrf.mxu0 }
 0x421   : > { %v1282_v47 = vpop.f32.mrf.mxu1  ;;  %v1325_v1 = vpop.f32.mrf.mxu0 }
 0x423   : > { %v1284_v48 = vpop.f32.mrf.mxu1  ;;  %v1327_v49 = vpop.f32.mrf.mxu0 }
 0x424   : > { %v1418_v54 = vmax.f32 %v1280_v45, %v1284_v48  ;;  %v1432_v55 = vmax.f32 %v1323_v46, %v1327_v49  ;;  %v1495_v48 = vsub.s32 %v1492_v35, %v3473_v36  ;;  %v2947_v35 = vld [vmem:[#allocation11 + $0x168] sm:$0xff]  }
 0x425   : > { %v1286_v50 = vpop.f32.mrf.mxu1  ;;  %v1329_v51 = vpop.f32.mrf.mxu0 }
 0x426   : > { %v1425_v52 = vmax.f32 %v1282_v47, %v1286_v50  ;;  %v1439_v53 = vmax.f32 %v1325_v1, %v1329_v51  ;;  %v1419_v58 = vrot.slane %v1418_v54, 4  ;;  %v1433_v59 = vrot.slane %v1432_v55, 4 }
 0x428   : > { %v1426_v56 = vrot.slane %v1425_v52, 4  ;;  %v1440_v57 = vrot.slane %v1439_v53, 4  ;;  %v1420_v62 = vmax.f32 %v1418_v54, %v1419_v58  ;;  %v1434_v63 = vmax.f32 %v1432_v55, %v1433_v59 }
 0x42a   : > { %v1427_v60 = vmax.f32 %v1425_v52, %v1426_v56  ;;  %v1441_v61 = vmax.f32 %v1439_v53, %v1440_v57  ;;  %v1421_v3 = vrot.slane %v1420_v62, 2  ;;  %v1435_v4 = vrot.slane %v1434_v63, 2 }
 0x42c   : > { %v1428_v0 = vrot.slane %v1427_v60, 2  ;;  %v1442_v2 = vrot.slane %v1441_v61, 2  ;;  %v1422_v11 = vmax.f32 %v1420_v62, %v1421_v3  ;;  %v1436_v12 = vmax.f32 %v1434_v63, %v1435_v4 }
 0x42e   : > { %v1429_v7 = vmax.f32 %v1427_v60, %v1428_v0  ;;  %v1443_v8 = vmax.f32 %v1441_v61, %v1442_v2  ;;  %v1423_v28 = vrot.slane %v1422_v11, 1  ;;  %v1437_v29 = vrot.slane %v1436_v12, 1 }
 0x430   : > { %v1430_v17 = vrot.slane %v1429_v7, 1  ;;  %v1444_v21 = vrot.slane %v1443_v8, 1  ;;  %v1424_v42 = vmax.f32 %v1422_v11, %v1423_v28  ;;  %v1438_v43 = vmax.f32 %v1436_v12, %v1437_v29  ;;  %v2942_v28 = vld [vmem:[#allocation11 + $0x1b8] sm:$0xff]   ;;  %v2943_v29 = vld [vmem:[#allocation11 + $0x170] sm:$0xff]  }
 0x431   : > { %v1624_v11 = vsub.s32 3, %v3473_v36  ;;  %v1612_v12 = vsub.s32 0, %v3473_v36 }
 0x432   : > { %v1431_v34 = vmax.f32 %v1429_v7, %v1430_v17  ;;  %v1445_v37 = vmax.f32 %v1443_v8, %v1444_v21  ;;  %v1606_v7 = vld [vmem:[%s3549_s10] sm:$0xff] }
 0x434   : > { %v1486_v1 = vcombine.low %v1424_v42, %v1431_v34  ;;  %v1487_v49 = vcombine.low %v1438_v43, %v1445_v37  ;;  %v2946_v34 = vld [vmem:[#allocation11 + $0x1b0] sm:$0xff]   ;;  %v2948_v37 = vld [vmem:[#allocation11 + $0x1e8] sm:$0xff]   ;;  %v2953_v42 = vld [vmem:[#allocation11 + $0x120] sm:$0xff]  }
 0x435   : > { %v2954_v43 = vld [vmem:[#allocation11 + $0x1a0] sm:$0xff]  }
 0x436   : > { %v1496_v56 = vrot.slane %v1486_v1, %v1495_v48  ;;  %v1503_v57 = vrot.slane %v1487_v49, %v1495_v48  ;;  %v2959_v1 = vld [vmem:[#allocation11 + $0x150] sm:$0xff]  }
 0x437   : > { %v2961_v49 = vld [vmem:[#allocation11 + $0x110] sm:$0xff]  }
 0x438   : > { %v1518_v0 = vcombine.low %v1496_v56, %v1503_v57  ;;  %v2968_v56 = vld [vmem:[#allocation11 + $0x1c0] sm:$0xff]   ;;  %v1628_v57 = vsub.s32 4, %v3473_v36 }
 0x43f   : > { %v1366_v5 = vpop.f32.mrf.mxu1  ;;  %v1409_v6 = vpop.f32.mrf.mxu0 }
 0x441   : > { %v1368_v9 = vpop.f32.mrf.mxu1  ;;  %v1411_v10 = vpop.f32.mrf.mxu0 }
 0x443   : > { %v1370_v13 = vpop.f32.mrf.mxu1  ;;  %v1413_v14 = vpop.f32.mrf.mxu0 }
 0x444   : > { %v1446_v15 = vmax.f32 %v1366_v5, %v1370_v13  ;;  %v1460_v16 = vmax.f32 %v1409_v6, %v1413_v14  ;;  %v1526_v5 = vrot.slane %v1518_v0, %v1495_v48  ;;  %v1620_v13 = vsub.s32 2, %v3473_v36 }
 0x445   : > { %v1372_v22 = vpop.f32.mrf.mxu1  ;;  %v1415_v23 = vpop.f32.mrf.mxu0  ;;  %v1632_v14 = vsub.s32 5, %v3473_v36 }
 0x446   : > { %v1447_v24 = vrot.slane %v1446_v15, 4  ;;  %v1461_v25 = vrot.slane %v1460_v16, 4  ;;  %v1453_v26 = vmax.f32 %v1368_v9, %v1372_v22  ;;  %v1467_v27 = vmax.f32 %v1411_v10, %v1415_v23 }
 0x447   : > { %v1616_v9 = vsub.s32 1, %v3473_v36 }
 0x448   : > { %v1448_v30 = vmax.f32 %v1446_v15, %v1447_v24  ;;  %v1462_v31 = vmax.f32 %v1460_v16, %v1461_v25  ;;  %v1454_v32 = vrot.slane %v1453_v26, 4  ;;  %v1468_v33 = vrot.slane %v1467_v27, 4 }
 0x449   : > { %v1640_v15 = vsub.s32 7, %v3473_v36 }
 0x44a   : > { %v1449_v38 = vrot.slane %v1448_v30, 2  ;;  %v1463_v39 = vrot.slane %v1462_v31, 2  ;;  %v1455_v40 = vmax.f32 %v1453_v26, %v1454_v32  ;;  %v1469_v41 = vmax.f32 %v1467_v27, %v1468_v33  ;;  %v2941_v27 = vld [vmem:[#allocation11 + $0x138] sm:$0xff]   ;;  %v2945_v33 = vld [vmem:[#allocation11 + $0x130] sm:$0xff]  }
 0x44c   : > { %v1450_v44 = vmax.f32 %v1448_v30, %v1449_v38  ;;  %v1464_v45 = vmax.f32 %v1462_v31, %v1463_v39  ;;  %v1456_v46 = vrot.slane %v1455_v40, 2  ;;  %v1470_v47 = vrot.slane %v1469_v41, 2  ;;  %v2944_v30 = vld [vmem:[#allocation11 + $0x1f0] sm:$0xff]   ;;  %v2949_v38 = vld [vmem:[#allocation11 + $0x128] sm:$0xff]  }
 0x44d   : > { %v2950_v39 = vld [vmem:[#allocation11 + $0x1a8] sm:$0xff]  }
 0x44e   : > { %v1451_v50 = vrot.slane %v1450_v44, 1  ;;  %v1465_v51 = vrot.slane %v1464_v45, 1  ;;  %v1457_v52 = vmax.f32 %v1455_v40, %v1456_v46  ;;  %v1471_v53 = vmax.f32 %v1469_v41, %v1470_v47  ;;  %v2951_v40 = vld [vmem:[#allocation11 + $0x160] sm:$0xff]   ;;  %v2957_v46 = vld [vmem:[#allocation11 + $0x118] sm:$0xff]  }
 0x44f   : > { %v2952_v41 = vld [vmem:[#allocation11 + $0x1e0] sm:$0xff]   ;;  %v2958_v47 = vld [vmem:[#allocation11 + $0x198] sm:$0xff]  }
 0x450   : > { %v1458_v54 = vrot.slane %v1457_v52, 1  ;;  %v1472_v55 = vrot.slane %v1471_v53, 1  ;;  %v1452_v58 = vmax.f32 %v1450_v44, %v1451_v50  ;;  %v1466_v59 = vmax.f32 %v1464_v45, %v1465_v51  ;;  %v2955_v44 = vld [vmem:[#allocation11 + $0x158] sm:$0xff]   ;;  %v2962_v50 = vld [vmem:[#allocation11 + $0x190] sm:$0xff]   ;;  %v2963_v51 = vld [vmem:[#allocation11 + $0x148] sm:$0xff]  }
 0x451   : > { %v2956_v45 = vld [vmem:[#allocation11 + $0x1d8] sm:$0xff]  }
 0x452   : > { %v1459_v60 = vmax.f32 %v1457_v52, %v1458_v54  ;;  %v1473_v61 = vmax.f32 %v1471_v53, %v1472_v55  ;;  %v2964_v52 = vld [vmem:[#allocation11 + $0x1c8] sm:$0xff]   ;;  %v2967_v55 = vld [vmem:[#allocation11 + $0x140] sm:$0xff]  }
 0x453   : > { %v2965_v53 = vld [vmem:[#allocation11 + $0x108] sm:$0xff]  }
 0x454   : > { %v1488_v62 = vcombine.low %v1452_v58, %v1459_v60  ;;  %v1489_v63 = vcombine.low %v1466_v59, %v1473_v61  ;;  %v2966_v54 = vld [vmem:[#allocation11 + $0x188] sm:$0xff]   ;;  %v1636_v58 = vsub.s32 6, %v3473_v36  ;;  %v2969_v59 = vld [vmem:[#allocation11 + $0x100] sm:$0xff]  }
 0x455   : > { %v2970_v60 = vld [vmem:[#allocation11 + $0x180] sm:$0xff]  }
 0x456   : > { %v1510_v2 = vrot.slane %v1488_v62, %v1495_v48  ;;  %v1517_v3 = vrot.slane %v1489_v63, %v1495_v48 }
 0x458   : > { %v1519_v4 = vcombine.low %v1510_v2, %v1517_v3 }
 0x45a   : > { %v1533_v6 = vrot.slane %v1519_v4, %v1495_v48  ;;  %v2960_v48 = vld [vmem:[#allocation11 + $0x1d0] sm:$0xff]  }
 0x45c   : > { %v1534_v8 = vcombine.low %v1526_v5, %v1533_v6 }
 0x45e   : > { %v1607_v10 = vadd.f32 %v1606_v7, %v1534_v8 }
 0x460   : > { %v3485_v16 = vmax.f32 %v1607_v10, 0.0  ;;  %v1786_v10 = vld [vmem:[%s3551_s12] sm:$0x1] }
 0x462   : > { %v1617_v17 = vrot.slane %v3485_v16, %v1616_v9  ;;  %v1625_v18 = vrot.slane %v3485_v16, %v1624_v11  ;;  %v1613_v19 = vrot.slane %v3485_v16, %v1612_v12  ;;  %v1621_v20 = vrot.slane %v3485_v16, %v1620_v13 }
 0x463   : > { %v1633_v21 = vrot.slane %v3485_v16, %v1632_v14  ;;  %v1641_v22 = vrot.slane %v3485_v16, %v1640_v15  ;;  %v1629_v61 = vrot.slane %v3485_v16, %v1628_v57  ;;  %v1637_v62 = vrot.slane %v3485_v16, %v1636_v58 }
 0x464   : > { %v1651_v23 = vpack.c.bf16 %v1617_v17, %v1617_v17  ;;  %v1653_v24 = vpack.c.bf16 %v1625_v18, %v1625_v18  ;;  %v1650_v25 = vpack.c.bf16 %v1613_v19, %v1613_v19  ;;  %v1652_v26 = vpack.c.bf16 %v1621_v20, %v1621_v20 }
 0x465   : > { %v1655_v31 = vpack.c.bf16 %v1633_v21, %v1633_v21  ;;  %v1657_v32 = vpack.c.bf16 %v1641_v22, %v1641_v22  ;;  %v1654_v63 = vpack.c.bf16 %v1629_v61, %v1629_v61  ;;  %v1656_v0 = vpack.c.bf16 %v1637_v62, %v1637_v62 }
 0x466   : > { %2203 = vmatprep.mubr.bf16.mxu1 %v1651_v23  ;;  %2243 = vmatprep.mubr.bf16.mxu0 %v1653_v24 }
 0x467   : > { %2204 = vmatmul.mubr.bf16.vlgmr.msra.gmra.mxu1 %v1650_v25  ;;  %2244 = vmatmul.mubr.bf16.vlgmr.msra.gmra.mxu0 %v1652_v26 }
 0x468   : > { %2696 = vmatpush3.bf16.msra.mxu1 %v2941_v27  ;;  %2718 = vmatpush3.bf16.msra.mxu0 %v2942_v28 }
 0x469   : > { %2283 = vmatprep.mubr.bf16.mxu1 %v1655_v31  ;;  %2323 = vmatprep.mubr.bf16.mxu0 %v1657_v32 }
 0x46a   : > { %2697 = vmatprep.subr.bf16.mxu1 %v2943_v29  ;;  %2719 = vmatprep.subr.bf16.mxu0 %v2944_v30 }
 0x46c   : > { %2698 = vmatpush3.bf16.msra.mxu1 %v2945_v33  ;;  %2720 = vmatpush3.bf16.msra.mxu0 %v2946_v34 }
 0x46d   : > { %2699 = vmatprep.subr.bf16.mxu1 %v2947_v35  ;;  %2721 = vmatprep.subr.bf16.mxu0 %v2948_v37 }
 0x470   : > { %2700 = vmatpush3.bf16.msra.mxu1 %v2949_v38  ;;  %2722 = vmatpush3.bf16.msra.mxu0 %v2950_v39 }
 0x471   : > { %2701 = vmatprep.subr.bf16.mxu1 %v2951_v40  ;;  %2723 = vmatprep.subr.bf16.mxu0 %v2952_v41 }
 0x474   : > { %2702 = vmatpush3.bf16.msra.mxu1 %v2953_v42  ;;  %2724 = vmatpush3.bf16.msra.mxu0 %v2954_v43 }
 0x475   : > { %2703 = vmatprep.subr.bf16.mxu1 %v2955_v44  ;;  %2725 = vmatprep.subr.bf16.mxu0 %v2956_v45 }
 0x478   : > { %2704 = vmatpush3.bf16.msra.mxu1 %v2957_v46  ;;  %2726 = vmatpush3.bf16.msra.mxu0 %v2958_v47 }
 0x479   : > { %2705 = vmatprep.subr.bf16.mxu1 %v2959_v1  ;;  %2727 = vmatprep.subr.bf16.mxu0 %v2960_v48 }
 0x47c   : > { %2706 = vmatpush3.bf16.msra.mxu1 %v2961_v49  ;;  %2728 = vmatpush3.bf16.msra.mxu0 %v2962_v50 }
 0x47d   : > { %2707 = vmatprep.subr.bf16.mxu1 %v2963_v51  ;;  %2729 = vmatprep.subr.bf16.mxu0 %v2964_v52 }
 0x480   : > { %2708 = vmatpush3.bf16.msra.mxu1 %v2965_v53  ;;  %2730 = vmatpush3.bf16.msra.mxu0 %v2966_v54 }
 0x481   : > { %2709 = vmatprep.subr.bf16.mxu1 %v2967_v55  ;;  %2731 = vmatprep.subr.bf16.mxu0 %v2968_v56 }
 0x484   : > { %2710 = vmatpush3.bf16.msra.mxu1 %v2969_v59  ;;  %2732 = vmatpush3.bf16.msra.mxu0 %v2970_v60 }
 0x487   : > { %2284 = vmatmul.mubr.bf16.vlgmr.msra.gmra.mxu1 %v1654_v63  ;;  %2324 = vmatmul.mubr.bf16.vlgmr.msra.gmra.mxu0 %v1656_v0 }
 0x527   : > { %v2667_v2 = vpop.f32.mrf.mxu1  ;;  %v2689_v3 = vpop.f32.mrf.mxu0 }
 0x529   : > { %v2668_v36 = vpop.f32.mrf.mxu1  ;;  %v2690_v4 = vpop.f32.mrf.mxu0 }
 0x52a   : > { %v2669_v9 = vadd.f32 %v2668_v36, %v2667_v2  ;;  %v2691_v14 = vadd.f32 %v2690_v4, %v2689_v3 }
 0x52b   : > { %v2670_v5 = vpop.f32.mrf.mxu1  ;;  %v2692_v6 = vpop.f32.mrf.mxu0 }
 0x52c   : > { %v2206_v11 = vadd.f32 %v2669_v9, %v1786_v10 }
 0x52d   : > { %v2671_v7 = vpop.f32.mrf.mxu1  ;;  %v2693_v8 = vpop.f32.mrf.mxu0 }
 0x52e   : > { %v2246_v17 = vadd.f32 %v2691_v14, %v2206_v11 }
 0x547   : > { %v2711_v12 = vpop.f32.mrf.mxu1  ;;  %v2733_v13 = vpop.f32.mrf.mxu0 }
 0x549   : > { %v2712_v15 = vpop.f32.mrf.mxu1  ;;  %v2734_v16 = vpop.f32.mrf.mxu0 }
 0x54a   : > { %v2713_v18 = vadd.f32 %v2712_v15, %v2711_v12  ;;  %v2735_v22 = vadd.f32 %v2734_v16, %v2733_v13 }
 0x54b   : > { %v2714_v19 = vpop.f32.mrf.mxu1  ;;  %v2736_v20 = vpop.f32.mrf.mxu0 }
 0x54c   : > { %v2286_v21 = vadd.f32 %v2713_v18, %v2246_v17 }
 0x54d   : > { %v2715_v23 = vpop.f32.mrf.mxu1  ;;  %v2737_v24 = vpop.f32.mrf.mxu0 }
 0x54e   : > { %v2326_v25 = vadd.f32 %v2735_v22, %v2286_v21 }
 0x550   : > { %v2331_v26 = vmax.f32 %v2326_v25, 0.0 }
 0x552   : > { %2332 = vst [vmem:[%s526_s15] sm:$0x1] %v2331_v26 }
 0x553   : > { %3114 = shalt.err (!%p3111_p4)
}
 0x554   : > { %s3115_s16 = scalar_lea.hbm %s2344_s14, 16  ;;  %s3119_s27 = scalar_lea.hbm %s3587_s19, 32 }
 0x555   : > { %p3116_p10 = scmp.ne.s32.totalorder %s2344_s14, %s3115_s16  ;;  %p3120_p3 = scmp.lt.s32.totalorder %s2344_s14, %s3587_s19 }
 0x556   : > { %p3121_p0 = scmp.lt.s32.totalorder %s3119_s27, %s3115_s16 }
 0x557   : > { %p3117_p11 = pnand %p3116_p10, %p3588_p7 }
 0x558   : > { %p3122_p13 = por %p3121_p0, %p3120_p3 }
 0x559   : > { %p3118_p5 = pneg %p3117_p11 }
 0x55b   : > { %p3123_p6 = pnand %p3122_p13, %p3118_p5 }
 0x55d   : > { %3126 = shalt.err (!%p3123_p6)
}
 0x55e   : > { %2795 = dma.vmem_to_hbm [thread:$0]  (%p3588_p7), %s2347_s20, 16, %s2344_s14, %s2334_s13  }
 0x55f PF: > { %s3589_s24 = sld [smem:[#allocation20_spill]] }
 0x560   : > { %s3590_s22 = sld [smem:[#allocation17_spill]] }
 0x561   : > { %s3591_s25 = sld [smem:[#allocation22_spill]] }
 0x565   : > { %p2827_p9 = scmp.ge.s32.totalorder %s3589_s24, 2 }
 0x566   : > { %s2358_s23 = sand.u32 1, %s3590_s22  }
 0x567   : > { %p3592_p12 = scmp.ne.s32.totalorder %s3591_s25, 0  ;;  %s2359_s30 = scalar_lea.sflag [#allocation5], %s2358_s23 }
 0x569   : > { %p2814_p8 = pnand %p2827_p9, %p3592_p12 }
 0x56b   : > { %p2815_p1 = pneg %p2814_p8 }
 0x56d   : > { %3164 = dma.done.wait (%p2815_p1), %s2359_s30, 16  }
 0x56e   : > { %3166 = vsyncadd (%p2815_p1), %s2359_s30, 4294967280  ;;  %s29_s30 = sadd.s32 1, %s3589_s24   ;;  %s3593_s28 = sld [smem:[#allocation18_spill]] }
 0x56f   : > { %p26_p2 = scmp.ge.s32.totalorder %s29_s30, 4   ;;  %s3594_s27 = sld [smem:[#allocation23_spill]] }
 0x570   : > { %s3595_s18 = sld [smem:[#allocation19_spill]]  ;;  %s3597_s25 = smov %s3173_s26 }
 0x571   : > { %s3596_s29 = sld [smem:[#allocation21_spill]] }
 0x572   :  { %28 = sbr.rel (!%p26_p2) target bundleno = 9 (0x9), region = 140 }
 0x574   : > { %s3598_s26 = smov %s3593_s28 }
 0x576   : > { %s3599_s28 = smov %s3595_s18 }
 0x577   :  { %2363 = vsyncpa [#allocation4], 1 }
 0x578   :  { %2365 = vsyncpa [#allocation4 + $0x1], 1 }
 0x579   :  { %2366 = vsyncpa [#allocation7], 1 }
 0x57a   :  { %2367 = vsyncpa [#allocation10], 1 }
 0x57b   :  { %2368 = vsyncpa [#allocation5], 1 }
 0x57c   :  { %2370 = vsyncpa [#allocation5 + $0x1], 1 }

</bundles_post_ra>
